<compile_context>
chip_gen: v5e
topology: v5e:2x2
jax: 0.10.0
libtpu: 0.0.40
codegen_flags: <defaults>
</compile_context>

<pallas_src>
import functools
import math
from typing import NamedTuple

import numpy as np
import jax
import jax.numpy as jnp
from jax.experimental import pallas as pl
from jax.experimental.pallas import tpu as pltpu


def _round_up(n, m):
    return (n + m - 1) // m * m


def _vmem_capacity_bytes():
    """Physical per-core VMEM; conservative fallback if the query fails."""
    try:
        return int(pltpu.get_tpu_info().vmem_capacity_bytes)
    except Exception:
        return 64 * 1024 * 1024  # v7x per-TensorCore VMEM (smallest of the fleet)


# --------------------------------------------------------------------------
# Kernel body
# --------------------------------------------------------------------------
def _phi_mlp_kernel(num_hidden_layers, hidden_pad, *refs):
    """refs = (x_ref, [w_gateproj, b_gateproj] * L, w_out, b_out, o_ref).

    Weights are pre-fused (gate | proj along the output dim), pre-padded to
    lane-aligned feature dims, and arrive in bf16 for the MXU; biases are f32
    and are added to the f32 accumulator. x arrives bf16 (MXU feed dtype).
    """
    x_ref = refs[0]
    w_refs = refs[1:-1]
    o_ref = refs[-1]

    x = x_ref[...]
    residual = None
    idx = 0
    for _ in range(num_hidden_layers):
        w_gp = w_refs[idx][...]       # (in_pad, 2*hidden_pad) bf16
        b_gp = w_refs[idx + 1][...]   # (1, 2*hidden_pad)      f32
        idx += 2

        h = jnp.dot(x.astype(jnp.bfloat16), w_gp,
                    preferred_element_type=jnp.float32) + b_gp
        gate = h[:, :hidden_pad]            # lane-aligned split (multiple of 128)
        proj = h[:, hidden_pad:]
        gate = gate * jax.lax.logistic(gate)  # SiLU (EUP), f32
        gp = gate * proj
        x = gp if residual is None else residual + gp
        residual = x

    w_out = w_refs[idx][...]       # (in_pad, out_pad) bf16
    b_out = w_refs[idx + 1][...]   # (1, out_pad)      f32
    out = jnp.dot(x.astype(jnp.bfloat16), w_out,
                  preferred_element_type=jnp.float32) + b_out
    o_ref[...] = out.astype(o_ref.dtype)


# --------------------------------------------------------------------------
# One-time parameter packing (hoisted out of the forward path)
# --------------------------------------------------------------------------
class PackedPhiMLP(NamedTuple):
    flat_args: tuple     # (w_gateproj, b_gateproj) * L, w_out, b_out
    num_hidden: int
    input_dim: int
    hidden_dim: int
    output_dim: int
    in_pad: int
    hid_pad: int
    out_pad: int


def pack_phi_mlp_params(blocks, out_w, out_b, input_dim):
    """Fuse (gate | proj), pad every feature dim to a multiple of 128 lanes,
    cast weights to bf16 (biases stay f32). Call once and reuse."""
    out_dim = out_w.shape[1]
    num_hidden = len(blocks)
    hidden_dim = blocks[0][0].shape[1] if num_hidden else input_dim

    in_pad = _round_up(input_dim, 128)
    hid_pad = _round_up(hidden_dim, 128)
    out_pad = _round_up(out_dim, 128)

    flat_args = []
    cur_in_pad = in_pad
    for (wg, bg, wp, bp) in blocks:
        cur_in = wg.shape[0]
        w_gp = jnp.zeros((cur_in_pad, 2 * hid_pad), jnp.bfloat16)
        w_gp = w_gp.at[:cur_in, :hidden_dim].set(wg.astype(jnp.bfloat16))
        w_gp = w_gp.at[:cur_in, hid_pad:hid_pad + hidden_dim].set(
            wp.astype(jnp.bfloat16))
        b_gp = jnp.zeros((1, 2 * hid_pad), jnp.float32)
        b_gp = b_gp.at[:, :hidden_dim].set(bg.astype(jnp.float32).reshape(1, -1))
        b_gp = b_gp.at[:, hid_pad:hid_pad + hidden_dim].set(
            bp.astype(jnp.float32).reshape(1, -1))
        flat_args += [w_gp, b_gp]
        cur_in_pad = hid_pad

    w_o = jnp.zeros((cur_in_pad, out_pad), jnp.bfloat16)
    w_o = w_o.at[:out_w.shape[0], :out_dim].set(out_w.astype(jnp.bfloat16))
    b_o = jnp.zeros((1, out_pad), jnp.float32)
    b_o = b_o.at[:, :out_dim].set(out_b.astype(jnp.float32).reshape(1, -1))
    flat_args += [w_o, b_o]

    flat_args = tuple(jax.block_until_ready(a) for a in flat_args)
    return PackedPhiMLP(flat_args=flat_args, num_hidden=num_hidden,
                        input_dim=input_dim, hidden_dim=hidden_dim,
                        output_dim=out_dim, in_pad=in_pad, hid_pad=hid_pad,
                        out_pad=out_pad)


# --------------------------------------------------------------------------
# Forward pass
# --------------------------------------------------------------------------
def phi_mlp_pallas(x, packed: PackedPhiMLP, *, row_tile=None,
                   out_dtype=jnp.float32):
    """x: (..., input_dim). packed: output of pack_phi_mlp_params()."""
    orig_shape = x.shape
    input_dim = orig_shape[-1]
    assert input_dim == packed.input_dim, "input dim mismatch vs packed params"
    rows = math.prod(orig_shape[:-1]) if len(orig_shape) > 1 else 1

    flat_args = packed.flat_args
    num_hidden = packed.num_hidden
    in_pad, hid_pad, out_pad = packed.in_pad, packed.hid_pad, packed.out_pad
    out_dim = packed.output_dim

    out_itemsize = np.dtype(out_dtype).itemsize
    weight_bytes = sum(a.size * a.dtype.itemsize for a in flat_args)

    # ---- per-generation VMEM budget (physical minus headroom) ----
    phys = _vmem_capacity_bytes()
    vmem_cap = max(min(phys - (8 << 20), int(phys * 0.85)), 32 << 20)

    # ---- row tile: as big as the budget allows, but >= 2 grid steps ----
    row_align = 16  # bf16 activations: native (16, 128) sublane tile
    if row_tile is None:
        per_row = (2 * 2 * in_pad                  # bf16 x tile, double-buffered
                   + 2 * out_itemsize * out_pad    # out tile, double-buffered
                   + 4 * 4 * 2 * hid_pad)          # ~4 live f32 (., 2*hid) temps
        avail = max(vmem_cap - weight_bytes, 4 << 20)
        tm = (int(0.6 * avail) // per_row) // row_align * row_align
        tm = min(max(tm, row_align), 512)
    else:
        tm = max(row_align, _round_up(row_tile, row_align))
    # Keep at least two grid steps when rows allow (v7x dual-TC sharding) and
    # avoid over-padding tiny batches up to a big tile.
    tm = min(tm, max(row_align, _round_up(pl.cdiv(max(rows, 1), 2), row_align)))
    rows_pad = _round_up(max(rows, 1), tm)
    grid = (rows_pad // tm,)

    # ---- activation padding + bf16 cast (only work done per call) ----
    x_flat = x.reshape(rows, input_dim)
    if rows_pad == rows and in_pad == input_dim:
        x_pad = x_flat.astype(jnp.bfloat16)
    else:
        x_pad = jnp.zeros((rows_pad, in_pad), jnp.bfloat16)
        x_pad = x_pad.at[:rows, :input_dim].set(x_flat.astype(jnp.bfloat16))

    # ---- advisory cost estimate ----
    flops = 0
    cur_in = in_pad
    for _ in range(num_hidden):
        flops += 2 * rows_pad * cur_in * (2 * hid_pad)
        cur_in = hid_pad
    flops += 2 * rows_pad * cur_in * out_pad
    transcendentals = rows_pad * hid_pad * num_hidden
    bytes_accessed = (x_pad.size * x_pad.dtype.itemsize + weight_bytes
                      + rows_pad * out_pad * out_itemsize)
    cost = pl.CostEstimate(flops=int(flops),
                           transcendentals=int(transcendentals),
                           bytes_accessed=int(bytes_accessed))

    kernel = functools.partial(_phi_mlp_kernel, num_hidden, hid_pad)
    out_shape = jax.ShapeDtypeStruct((rows_pad, out_pad), out_dtype)
    x_spec = pl.BlockSpec((tm, in_pad), lambda i: (i, 0))
    out_spec = pl.BlockSpec((tm, out_pad), lambda i: (i, 0))

    def run(single_buffer_weights):
        if single_buffer_weights:
            # Weights never change across grid steps -> one resident buffer.
            w_specs = [pl.BlockSpec(a.shape, lambda i: (0, 0),
                                    pipeline_mode=pl.Buffered(1))
                       for a in flat_args]
            wbuf = 1
        else:
            w_specs = [pl.BlockSpec(a.shape, lambda i: (0, 0))
                       for a in flat_args]
            wbuf = 2
        tile_bytes = 2 * (tm * in_pad * 2 + tm * out_pad * out_itemsize)
        interm_bytes = 4 * tm * (2 * hid_pad) * 4   # live f32 temporaries
        vmem_need = wbuf * weight_bytes + tile_bytes + interm_bytes
        vmem_limit = int(min(vmem_cap, max(32 << 20, int(1.25 * vmem_need))))
        compiler_params = pltpu.CompilerParams(
            dimension_semantics=("parallel",),
            vmem_limit_bytes=vmem_limit,
        )
        return pl.pallas_call(
            kernel,
            out_shape=out_shape,
            grid=grid,
            in_specs=[x_spec] + w_specs,
            out_specs=out_spec,
            compiler_params=compiler_params,
            cost_estimate=cost,
        )(x_pad, *flat_args)

    try:
        out_padded = run(True)
    except Exception:
        # Fall back to default double-buffered weights if this JAX build
        # rejects pipeline_mode=pl.Buffered(1); result is identical.
        out_padded = run(False)

    if rows_pad == rows and out_pad == out_dim:
        out = out_padded
    else:
        out = out_padded[:rows, :out_dim]
    return out.reshape(*orig_shape[:-1], out_dim)


# --------------------------------------------------------------------------
# Init + pure-JAX reference (forward semantics of the PyTorch module)
# --------------------------------------------------------------------------
def init_phi_mlp_params(key, input_dim, hidden_dim, output_dim, num_layers):
    """Deterministic init mirroring nn.Linear default (uniform +-1/sqrt(fan_in)).
    Weights stored pre-transposed as (in_dim, out_dim); biases as (1, out)."""
    if num_layers == 1:
        hidden_dim = input_dim

    blocks = []
    cur_in = input_dim
    for _ in range(1, num_layers):
        key, kwg, kbg, kwp, kbp = jax.random.split(key, 5)
        bound = 1.0 / math.sqrt(cur_in)
        wg = jax.random.uniform(kwg, (cur_in, hidden_dim), jnp.float32, -bound, bound)
        bg = jax.random.uniform(kbg, (1, hidden_dim), jnp.float32, -bound, bound)
        wp = jax.random.uniform(kwp, (cur_in, hidden_dim), jnp.float32, -bound, bound)
        bp = jax.random.uniform(kbp, (1, hidden_dim), jnp.float32, -bound, bound)
        blocks.append((wg, bg, wp, bp))
        cur_in = hidden_dim

    key, kwo, kbo = jax.random.split(key, 3)
    bound = 1.0 / math.sqrt(hidden_dim)
    out_w = jax.random.uniform(kwo, (hidden_dim, output_dim), jnp.float32, -bound, bound)
    out_b = jax.random.uniform(kbo, (1, output_dim), jnp.float32, -bound, bound)
    return blocks, out_w, out_b


def phi_mlp_reference(x_flat, blocks, out_w, out_b, matmul_dtype=None):
    """Pure-JAX reference of the PyTorch forward. If matmul_dtype is set, the
    matmul operands are cast to it (emulating the kernel's bf16 MXU feeds)."""
    def mm(a, b):
        if matmul_dtype is not None:
            a = a.astype(matmul_dtype)
            b = b.astype(matmul_dtype)
        return jnp.dot(a, b, preferred_element_type=jnp.float32)

    x = x_flat
    residual = 0.0
    for (wg, bg, wp, bp) in blocks:
        gate = jax.nn.silu(mm(x, wg) + bg)
        proj = mm(x, wp) + bp
        x = residual + gate * proj
        residual = x
    return mm(x, out_w) + out_b


if __name__ == "__main__":
    # Small, module-consistent shapes (deep case: SwiGLU blocks + residuals).
    batch, seq = 2, 16
    input_dim, hidden_dim, output_dim = 32, 64, 32
    num_layers = 3

    key = jax.random.PRNGKey(0)
    key, kx = jax.random.split(key)
    x = jax.random.normal(kx, (batch, seq, input_dim), jnp.float32)

    blocks, out_w, out_b = init_phi_mlp_params(
        key, input_dim, hidden_dim, output_dim, num_layers
    )
    packed = pack_phi_mlp_params(blocks, out_w, out_b, input_dim)  # once

    out = phi_mlp_pallas(x, packed)
    out = jax.block_until_ready(out)
    assert out.shape == (batch, seq, output_dim)

    x_flat = x.reshape(batch * seq, input_dim)
    # Tight check against a reference with the kernel's bf16 matmul feeds.
    ref_bf16 = phi_mlp_reference(
        x_flat, blocks, out_w, out_b, matmul_dtype=jnp.bfloat16
    ).reshape(batch, seq, output_dim)
    assert jnp.allclose(out, ref_bf16, atol=2e-3, rtol=2e-3), \
        "mismatch vs bf16-matmul reference"
    # Loose check against the exact f32 module semantics.
    ref_f32 = phi_mlp_reference(x_flat, blocks, out_w, out_b).reshape(
        batch, seq, output_dim
    )
    assert jnp.allclose(out, ref_f32, atol=5e-2, rtol=5e-2), \
        "mismatch vs f32 reference"

    print("KERNEL_OK")
</pallas_src>

<mosaic_0001>
module attributes {stable_mosaic.version = 11 : i64} {
  func.func @_phi_mlp_kernel(%arg0: i32, %arg1: memref<16x128xbf16, #tpu.memory_space<vmem>>, %arg2: memref<128x256xbf16, #tpu.memory_space<vmem>>, %arg3: memref<1x256xf32, #tpu.memory_space<vmem>>, %arg4: memref<128x256xbf16, #tpu.memory_space<vmem>>, %arg5: memref<1x256xf32, #tpu.memory_space<vmem>>, %arg6: memref<128x128xbf16, #tpu.memory_space<vmem>>, %arg7: memref<1x128xf32, #tpu.memory_space<vmem>>, %arg8: memref<16x128xf32, #tpu.memory_space<vmem>>) attributes {dimension_semantics = [#tpu.dimension_semantics<parallel>], iteration_bounds = array<i64: 2>, scalar_prefetch = 0 : i64, scratch_operands = 0 : i64, tpu.core_type = #tpu.core_type<tc>, window_params = [{transform_indices = @transform_0, window_bounds = array<i64: 16, 128>}, {pipeline_mode = #tpu.pipeline_mode<synchronous>, transform_indices = @transform_1, window_bounds = array<i64: 128, 256>}, {pipeline_mode = #tpu.pipeline_mode<synchronous>, transform_indices = @transform_2, window_bounds = array<i64: 1, 256>}, {pipeline_mode = #tpu.pipeline_mode<synchronous>, transform_indices = @transform_3, window_bounds = array<i64: 128, 256>}, {pipeline_mode = #tpu.pipeline_mode<synchronous>, transform_indices = @transform_4, window_bounds = array<i64: 1, 256>}, {pipeline_mode = #tpu.pipeline_mode<synchronous>, transform_indices = @transform_5, window_bounds = array<i64: 128, 128>}, {pipeline_mode = #tpu.pipeline_mode<synchronous>, transform_indices = @transform_6, window_bounds = array<i64: 1, 128>}, {transform_indices = @transform_7, window_bounds = array<i64: 16, 128>}]} {
    %c0 = arith.constant 0 : index
    %c0_0 = arith.constant 0 : index
    %0 = vector.load %arg1[%c0, %c0_0] : memref<16x128xbf16, #tpu.memory_space<vmem>>, vector<16x128xbf16>
    %c0_1 = arith.constant 0 : index
    %c0_2 = arith.constant 0 : index
    %1 = vector.load %arg2[%c0_1, %c0_2] : memref<128x256xbf16, #tpu.memory_space<vmem>>, vector<128x256xbf16>
    %c0_3 = arith.constant 0 : index
    %c0_4 = arith.constant 0 : index
    %2 = vector.load %arg3[%c0_3, %c0_4] : memref<1x256xf32, #tpu.memory_space<vmem>>, vector<1x256xf32>
    %cst = arith.constant dense<0.000000e+00> : vector<16x256xf32>
    %3 = tpu.matmul %0, %1, %cst {dimension_numbers = #tpu.dot_dimension_numbers<[1], [0], [0], [1], [0, 0, 1, 1], [], []>} : vector<16x128xbf16>, vector<128x256xbf16>, vector<16x256xf32> -> vector<16x256xf32>
    %4 = vector.broadcast %2 : vector<1x256xf32> to vector<16x256xf32>
    %5 = arith.addf %3, %4 : vector<16x256xf32>
    %6 = vector.extract_strided_slice %5 {offsets = [0, 0], sizes = [16, 128], strides = [1, 1]} : vector<16x256xf32> to vector<16x128xf32>
    %7 = vector.extract_strided_slice %5 {offsets = [0, 128], sizes = [16, 128], strides = [1, 1]} : vector<16x256xf32> to vector<16x128xf32>
    %8 = arith.negf %6 : vector<16x128xf32>
    %9 = math.exp %8 : vector<16x128xf32>
    %cst_5 = arith.constant 1.000000e+00 : f32
    %10 = vector.broadcast %cst_5 : f32 to vector<16x128xf32>
    %11 = arith.addf %10, %9 : vector<16x128xf32>
    %12 = arith.divf %10, %11 : vector<16x128xf32>
    %13 = arith.mulf %6, %12 : vector<16x128xf32>
    %14 = arith.mulf %13, %7 : vector<16x128xf32>
    %c0_6 = arith.constant 0 : index
    %c0_7 = arith.constant 0 : index
    %15 = vector.load %arg4[%c0_6, %c0_7] : memref<128x256xbf16, #tpu.memory_space<vmem>>, vector<128x256xbf16>
    %c0_8 = arith.constant 0 : index
    %c0_9 = arith.constant 0 : index
    %16 = vector.load %arg5[%c0_8, %c0_9] : memref<1x256xf32, #tpu.memory_space<vmem>>, vector<1x256xf32>
    %17 = arith.truncf %14 : vector<16x128xf32> to vector<16x128xbf16>
    %cst_10 = arith.constant dense<0.000000e+00> : vector<16x256xf32>
    %18 = tpu.matmul %17, %15, %cst_10 {dimension_numbers = #tpu.dot_dimension_numbers<[1], [0], [0], [1], [0, 0, 1, 1], [], []>} : vector<16x128xbf16>, vector<128x256xbf16>, vector<16x256xf32> -> vector<16x256xf32>
    %19 = vector.broadcast %16 : vector<1x256xf32> to vector<16x256xf32>
    %20 = arith.addf %18, %19 : vector<16x256xf32>
    %21 = vector.extract_strided_slice %20 {offsets = [0, 0], sizes = [16, 128], strides = [1, 1]} : vector<16x256xf32> to vector<16x128xf32>
    %22 = vector.extract_strided_slice %20 {offsets = [0, 128], sizes = [16, 128], strides = [1, 1]} : vector<16x256xf32> to vector<16x128xf32>
    %23 = arith.negf %21 : vector<16x128xf32>
    %24 = math.exp %23 : vector<16x128xf32>
    %cst_11 = arith.constant 1.000000e+00 : f32
    %25 = vector.broadcast %cst_11 : f32 to vector<16x128xf32>
    %26 = arith.addf %25, %24 : vector<16x128xf32>
    %27 = arith.divf %25, %26 : vector<16x128xf32>
    %28 = arith.mulf %21, %27 : vector<16x128xf32>
    %29 = arith.mulf %28, %22 : vector<16x128xf32>
    %30 = arith.addf %14, %29 : vector<16x128xf32>
    %c0_12 = arith.constant 0 : index
    %c0_13 = arith.constant 0 : index
    %31 = vector.load %arg6[%c0_12, %c0_13] : memref<128x128xbf16, #tpu.memory_space<vmem>>, vector<128x128xbf16>
    %c0_14 = arith.constant 0 : index
    %c0_15 = arith.constant 0 : index
    %32 = vector.load %arg7[%c0_14, %c0_15] : memref<1x128xf32, #tpu.memory_space<vmem>>, vector<1x128xf32>
    %33 = arith.truncf %30 : vector<16x128xf32> to vector<16x128xbf16>
    %cst_16 = arith.constant dense<0.000000e+00> : vector<16x128xf32>
    %34 = tpu.matmul %33, %31, %cst_16 {dimension_numbers = #tpu.dot_dimension_numbers<[1], [0], [0], [1], [0, 0, 1, 1], [], []>} : vector<16x128xbf16>, vector<128x128xbf16>, vector<16x128xf32> -> vector<16x128xf32>
    %35 = vector.broadcast %32 : vector<1x128xf32> to vector<16x128xf32>
    %36 = arith.addf %34, %35 : vector<16x128xf32>
    %c0_17 = arith.constant 0 : index
    %c0_18 = arith.constant 0 : index
    %37 = vector.load %arg8[%c0_17, %c0_18] : memref<16x128xf32, #tpu.memory_space<vmem>>, vector<16x128xf32>
    tpu.vector_store %arg8[%c0_17, %c0_18], %36 {strides = array<i32>} : memref<16x128xf32, #tpu.memory_space<vmem>>, vector<16x128xf32>,
    return
  }
  func.func @transform_0(%arg0: i32) -> (i32, i32) {
    %c0_i32 = arith.constant 0 : i32
    %c0_i32_0 = arith.constant 0 : i32
    return %arg0, %c0_i32 : i32, i32
  }
  func.func @transform_1(%arg0: i32) -> (i32, i32) {
    %c0_i32 = arith.constant 0 : i32
    %c0_i32_0 = arith.constant 0 : i32
    %c0_i32_1 = arith.constant 0 : i32
    return %c0_i32, %c0_i32_0 : i32, i32
  }
  func.func @transform_2(%arg0: i32) -> (i32, i32) {
    %c0_i32 = arith.constant 0 : i32
    %c0_i32_0 = arith.constant 0 : i32
    %c0_i32_1 = arith.constant 0 : i32
    return %c0_i32, %c0_i32_0 : i32, i32
  }
  func.func @transform_3(%arg0: i32) -> (i32, i32) {
    %c0_i32 = arith.constant 0 : i32
    %c0_i32_0 = arith.constant 0 : i32
    %c0_i32_1 = arith.constant 0 : i32
    return %c0_i32, %c0_i32_0 : i32, i32
  }
  func.func @transform_4(%arg0: i32) -> (i32, i32) {
    %c0_i32 = arith.constant 0 : i32
    %c0_i32_0 = arith.constant 0 : i32
    %c0_i32_1 = arith.constant 0 : i32
    return %c0_i32, %c0_i32_0 : i32, i32
  }
  func.func @transform_5(%arg0: i32) -> (i32, i32) {
    %c0_i32 = arith.constant 0 : i32
    %c0_i32_0 = arith.constant 0 : i32
    %c0_i32_1 = arith.constant 0 : i32
    return %c0_i32, %c0_i32_0 : i32, i32
  }
  func.func @transform_6(%arg0: i32) -> (i32, i32) {
    %c0_i32 = arith.constant 0 : i32
    %c0_i32_0 = arith.constant 0 : i32
    %c0_i32_1 = arith.constant 0 : i32
    return %c0_i32, %c0_i32_0 : i32, i32
  }
  func.func @transform_7(%arg0: i32) -> (i32, i32) {
    %c0_i32 = arith.constant 0 : i32
    %c0_i32_0 = arith.constant 0 : i32
    return %arg0, %c0_i32 : i32, i32
  }
}

module attributes {stable_mosaic.version = 11 : i64} {
  func.func @_phi_mlp_kernel(%arg0: i32, %arg1: memref<16x128xbf16, #tpu.memory_space<vmem>>, %arg2: memref<128x256xbf16, #tpu.memory_space<vmem>>, %arg3: memref<1x256xf32, #tpu.memory_space<vmem>>, %arg4: memref<128x256xbf16, #tpu.memory_space<vmem>>, %arg5: memref<1x256xf32, #tpu.memory_space<vmem>>, %arg6: memref<128x128xbf16, #tpu.memory_space<vmem>>, %arg7: memref<1x128xf32, #tpu.memory_space<vmem>>, %arg8: memref<16x128xf32, #tpu.memory_space<vmem>>) attributes {dimension_semantics = [#tpu.dimension_semantics<parallel>], iteration_bounds = array<i64: 2>, scalar_prefetch = 0 : i64, scratch_operands = 0 : i64, tpu.core_type = #tpu.core_type<tc>, window_params = [{transform_indices = @transform_0, window_bounds = array<i64: 16, 128>}, {pipeline_mode = #tpu.pipeline_mode<synchronous>, transform_indices = @transform_1, window_bounds = array<i64: 128, 256>}, {pipeline_mode = #tpu.pipeline_mode<synchronous>, transform_indices = @transform_2, window_bounds = array<i64: 1, 256>}, {pipeline_mode = #tpu.pipeline_mode<synchronous>, transform_indices = @transform_3, window_bounds = array<i64: 128, 256>}, {pipeline_mode = #tpu.pipeline_mode<synchronous>, transform_indices = @transform_4, window_bounds = array<i64: 1, 256>}, {pipeline_mode = #tpu.pipeline_mode<synchronous>, transform_indices = @transform_5, window_bounds = array<i64: 128, 128>}, {pipeline_mode = #tpu.pipeline_mode<synchronous>, transform_indices = @transform_6, window_bounds = array<i64: 1, 128>}, {transform_indices = @transform_7, window_bounds = array<i64: 16, 128>}]} {
    %c0 = arith.constant 0 : index
    %c0_0 = arith.constant 0 : index
    %0 = vector.load %arg1[%c0, %c0_0] : memref<16x128xbf16, #tpu.memory_space<vmem>>, vector<16x128xbf16>
    %c0_1 = arith.constant 0 : index
    %c0_2 = arith.constant 0 : index
    %1 = vector.load %arg2[%c0_1, %c0_2] : memref<128x256xbf16, #tpu.memory_space<vmem>>, vector<128x256xbf16>
    %c0_3 = arith.constant 0 : index
    %c0_4 = arith.constant 0 : index
    %2 = vector.load %arg3[%c0_3, %c0_4] : memref<1x256xf32, #tpu.memory_space<vmem>>, vector<1x256xf32>
    %cst = arith.constant dense<0.000000e+00> : vector<16x256xf32>
    %3 = tpu.matmul %0, %1, %cst {dimension_numbers = #tpu.dot_dimension_numbers<[1], [0], [0], [1], [0, 0, 1, 1], [], []>} : vector<16x128xbf16>, vector<128x256xbf16>, vector<16x256xf32> -> vector<16x256xf32>
    %4 = vector.broadcast %2 : vector<1x256xf32> to vector<16x256xf32>
    %5 = arith.addf %3, %4 : vector<16x256xf32>
    %6 = vector.extract_strided_slice %5 {offsets = [0, 0], sizes = [16, 128], strides = [1, 1]} : vector<16x256xf32> to vector<16x128xf32>
    %7 = vector.extract_strided_slice %5 {offsets = [0, 128], sizes = [16, 128], strides = [1, 1]} : vector<16x256xf32> to vector<16x128xf32>
    %8 = arith.negf %6 : vector<16x128xf32>
    %9 = math.exp %8 : vector<16x128xf32>
    %cst_5 = arith.constant 1.000000e+00 : f32
    %10 = vector.broadcast %cst_5 : f32 to vector<16x128xf32>
    %11 = arith.addf %10, %9 : vector<16x128xf32>
    %12 = arith.divf %10, %11 : vector<16x128xf32>
    %13 = arith.mulf %6, %12 : vector<16x128xf32>
    %14 = arith.mulf %13, %7 : vector<16x128xf32>
    %c0_6 = arith.constant 0 : index
    %c0_7 = arith.constant 0 : index
    %15 = vector.load %arg4[%c0_6, %c0_7] : memref<128x256xbf16, #tpu.memory_space<vmem>>, vector<128x256xbf16>
    %c0_8 = arith.constant 0 : index
    %c0_9 = arith.constant 0 : index
    %16 = vector.load %arg5[%c0_8, %c0_9] : memref<1x256xf32, #tpu.memory_space<vmem>>, vector<1x256xf32>
    %17 = arith.truncf %14 : vector<16x128xf32> to vector<16x128xbf16>
    %cst_10 = arith.constant dense<0.000000e+00> : vector<16x256xf32>
    %18 = tpu.matmul %17, %15, %cst_10 {dimension_numbers = #tpu.dot_dimension_numbers<[1], [0], [0], [1], [0, 0, 1, 1], [], []>} : vector<16x128xbf16>, vector<128x256xbf16>, vector<16x256xf32> -> vector<16x256xf32>
    %19 = vector.broadcast %16 : vector<1x256xf32> to vector<16x256xf32>
    %20 = arith.addf %18, %19 : vector<16x256xf32>
    %21 = vector.extract_strided_slice %20 {offsets = [0, 0], sizes = [16, 128], strides = [1, 1]} : vector<16x256xf32> to vector<16x128xf32>
    %22 = vector.extract_strided_slice %20 {offsets = [0, 128], sizes = [16, 128], strides = [1, 1]} : vector<16x256xf32> to vector<16x128xf32>
    %23 = arith.negf %21 : vector<16x128xf32>
    %24 = math.exp %23 : vector<16x128xf32>
    %cst_11 = arith.constant 1.000000e+00 : f32
    %25 = vector.broadcast %cst_11 : f32 to vector<16x128xf32>
    %26 = arith.addf %25, %24 : vector<16x128xf32>
    %27 = arith.divf %25, %26 : vector<16x128xf32>
    %28 = arith.mulf %21, %27 : vector<16x128xf32>
    %29 = arith.mulf %28, %22 : vector<16x128xf32>
    %30 = arith.addf %14, %29 : vector<16x128xf32>
    %c0_12 = arith.constant 0 : index
    %c0_13 = arith.constant 0 : index
    %31 = vector.load %arg6[%c0_12, %c0_13] : memref<128x128xbf16, #tpu.memory_space<vmem>>, vector<128x128xbf16>
    %c0_14 = arith.constant 0 : index
    %c0_15 = arith.constant 0 : index
    %32 = vector.load %arg7[%c0_14, %c0_15] : memref<1x128xf32, #tpu.memory_space<vmem>>, vector<1x128xf32>
    %33 = arith.truncf %30 : vector<16x128xf32> to vector<16x128xbf16>
    %cst_16 = arith.constant dense<0.000000e+00> : vector<16x128xf32>
    %34 = tpu.matmul %33, %31, %cst_16 {dimension_numbers = #tpu.dot_dimension_numbers<[1], [0], [0], [1], [0, 0, 1, 1], [], []>} : vector<16x128xbf16>, vector<128x128xbf16>, vector<16x128xf32> -> vector<16x128xf32>
    %35 = vector.broadcast %32 : vector<1x128xf32> to vector<16x128xf32>
    %36 = arith.addf %34, %35 : vector<16x128xf32>
    %c0_17 = arith.constant 0 : index
    %c0_18 = arith.constant 0 : index
    %37 = vector.load %arg8[%c0_17, %c0_18] : memref<16x128xf32, #tpu.memory_space<vmem>>, vector<16x128xf32>
    tpu.vector_store %arg8[%c0_17, %c0_18], %36 {strides = array<i32>} : memref<16x128xf32, #tpu.memory_space<vmem>>, vector<16x128xf32>,
    return
  }
  func.func @transform_0(%arg0: i32) -> (i32, i32) {
    %c0_i32 = arith.constant 0 : i32
    %c0_i32_0 = arith.constant 0 : i32
    return %arg0, %c0_i32 : i32, i32
  }
  func.func @transform_1(%arg0: i32) -> (i32, i32) {
    %c0_i32 = arith.constant 0 : i32
    %c0_i32_0 = arith.constant 0 : i32
    %c0_i32_1 = arith.constant 0 : i32
    return %c0_i32, %c0_i32_0 : i32, i32
  }
  func.func @transform_2(%arg0: i32) -> (i32, i32) {
    %c0_i32 = arith.constant 0 : i32
    %c0_i32_0 = arith.constant 0 : i32
    %c0_i32_1 = arith.constant 0 : i32
    return %c0_i32, %c0_i32_0 : i32, i32
  }
  func.func @transform_3(%arg0: i32) -> (i32, i32) {
    %c0_i32 = arith.constant 0 : i32
    %c0_i32_0 = arith.constant 0 : i32
    %c0_i32_1 = arith.constant 0 : i32
    return %c0_i32, %c0_i32_0 : i32, i32
  }
  func.func @transform_4(%arg0: i32) -> (i32, i32) {
    %c0_i32 = arith.constant 0 : i32
    %c0_i32_0 = arith.constant 0 : i32
    %c0_i32_1 = arith.constant 0 : i32
    return %c0_i32, %c0_i32_0 : i32, i32
  }
  func.func @transform_5(%arg0: i32) -> (i32, i32) {
    %c0_i32 = arith.constant 0 : i32
    %c0_i32_0 = arith.constant 0 : i32
    %c0_i32_1 = arith.constant 0 : i32
    return %c0_i32, %c0_i32_0 : i32, i32
  }
  func.func @transform_6(%arg0: i32) -> (i32, i32) {
    %c0_i32 = arith.constant 0 : i32
    %c0_i32_0 = arith.constant 0 : i32
    %c0_i32_1 = arith.constant 0 : i32
    return %c0_i32, %c0_i32_0 : i32, i32
  }
  func.func @transform_7(%arg0: i32) -> (i32, i32) {
    %c0_i32 = arith.constant 0 : i32
    %c0_i32_0 = arith.constant 0 : i32
    return %arg0, %c0_i32 : i32, i32
  }
}

</mosaic_0001>

<bundles_post_ra>
// kernel: tpu_custom_call.1
= control target key start
LH: loop header
LB: loop body
LE: loop exit
PB: predicated region body
PF: predicated region fallthrough
CT: control target
= control target key end

     0   :  { %s1742_s0 = inlined_call_operand.hbm [shape: bf16[32,128], index: 0, kind: input, shape index: {}]   ;;  %s1743_s1 = inlined_call_operand.hbm [shape: bf16[128,256], index: 1, kind: input, shape index: {}]   ;;  %s1744_s2 = inlined_call_operand.hbm [shape: f32[1,256], index: 2, kind: input, shape index: {}]   ;;  %s1745_s3 = inlined_call_operand.hbm [shape: bf16[128,256], index: 3, kind: input, shape index: {}]   ;;  %s1746_s4 = inlined_call_operand.vmem [shape: f32[1,256], index: 4, kind: input, shape index: {}]   ;;  %s1747_s5 = inlined_call_operand.hbm [shape: bf16[128,128], index: 5, kind: input, shape index: {}]   ;;  %s1748_s6 = inlined_call_operand.vmem [shape: f32[1,128], index: 6, kind: input, shape index: {}]   ;;  %s1749_s7 = inlined_call_operand.hbm [shape: f32[32,128], index: 7, kind: output, shape index: {}]  }
   0x1   :  { %1752 = sst [smem:[#allocation16_spill]] %s1743_s1 }
   0x2   :  { %12 = vsyncpa [#allocation3], 0 }
   0x3   :  { %14 = vsyncpa [#allocation3 + $0x1], 0 }
   0x4   :  { %15 = vsyncpa [#allocation6], 0 }
   0x5   :  { %16 = vsyncpa [#allocation9], 0 }
   0x6   :  { %17 = vsyncpa [#allocation4], 0 }
   0x7   :  { %19 = vsyncpa [#allocation4 + $0x1], 0  ;;  %s1551_s24 = smov 0   ;;  %s1553_s25 = smov 0  }
   0x8   :  { %s1555_s26 = smov 0   ;;  %s1557_s27 = smov 0  }
   0x9 LB: > { %s1572_s28 = sadd.s32 4294967295, %s1499_s27   ;;  %s932_s29 = sadd.s32 4294967294, %s1499_s27   ;;  %s1499_s27 = sphi %s1557_s27, %s1766_s27   ;;  %s1495_s26 = sphi %s1555_s26, %s1765_s26   ;;  %s1491_s25 = sphi %s1553_s25, %s1764_s25   ;;  %s1487_s24 = sphi %s1551_s24, %s1763_s24  }
   0xa   : > { %p45_p0 = scmp.ne.s32.totalorder %s1491_s25, %s1487_s24  ;;  %p46_p1 = scmp.eq.s32.totalorder %s1572_s28, 0 }
   0xb   : > { %p195_p2 = scmp.eq.s32.totalorder %s1572_s28, 1  ;;  %p201_p3 = scmp.eq.s32.totalorder %s932_s29, 1 }
   0xc   : > { %p1581_p4 = por %p46_p1, %p45_p0  ;;  %p933_p5 = scmp.ge.s32.totalorder %s1499_s27, 1 }
   0xd   : > { %p1586_p6 = por %p201_p3, %p45_p0  ;;  %p208_p7 = scmp.lt.s32.totalorder %s1499_s27, 3 }
   0xe   : > { %s1755_s1 = sld [smem:[#allocation16_spill]]  ;;  %s1501_s13 = smov [#allocation5]  }
   0xf   : > { %p1594_p8 = pnand %p933_p5, %p208_p7  ;;  %s221_s14 = sshll.u32 %s1501_s13, 4  ;;  %s222_s14 = int_to_ptr.vmem [resolvable:$true] %s221_s14 }
  0x10   : > { %s245_s18 = sshll.u32 %s1745_s3, 4  ;;  %s1502_s19 = smov 128   ;;  %s246_s18 = int_to_ptr.hbm [resolvable:$true] %s245_s18 }
  0x11   : > { %p1185_p9 = pneg %p1594_p8  ;;  %s1503_s20 = smov 8  }
  0x12   : > { %s1504_s21 = smov [#allocation8]   ;;  %s234_s9 = sshll.u32 %s1744_s2, 4  ;;  %s235_s9 = int_to_ptr.hbm [resolvable:$true] %s234_s9 }
  0x13   : > { %p1602_p10 = pnand %p1185_p9, %p46_p1  ;;  %s247_s22 = sshll.u32 %s1504_s21, 4  ;;  %s248_s22 = int_to_ptr.vmem [resolvable:$true] %s247_s22 }
  0x14   : > { %s219_s11 = sshll.u32 %s1755_s1, 4  ;;  %s262_s16 = sshll.u32 %s1747_s5, 4  ;;  %s220_s11 = int_to_ptr.hbm [resolvable:$true] %s219_s11  ;;  %s263_s16 = int_to_ptr.hbm [resolvable:$true] %s262_s16 }
  0x15   : > { %1188 = dma.hbm_to_vmem [thread:$0]  (!%p1602_p10), %s220_s11, 2048, %s222_s14, [#allocation6], %s1502_s19, %s1502_s19, %s1503_s20  }
  0x16   : > { %1194 = dma.hbm_to_vmem [thread:$0]  (!%p1602_p10), %s246_s18, 2048, %s248_s22, [#allocation9], %s1502_s19, %s1502_s19, %s1503_s20  }
  0x17   : > { %s1505_s11 = smov [#allocation7]   ;;  %s1506_s17 = smov [#allocation10]  }
  0x18   : > { %s236_s14 = sshll.u32 %s1505_s11, 4  ;;  %s264_s18 = sshll.u32 %s1506_s17, 4  ;;  %s237_s14 = int_to_ptr.vmem [resolvable:$true] %s236_s14  ;;  %s265_s18 = int_to_ptr.vmem [resolvable:$true] %s264_s18 }
  0x19   : > { %1191 = dma.hbm_to_vmem [thread:$0]  (!%p1602_p10), %s235_s9, 32, %s237_s14, [#allocation6]  }
  0x1a   : > { %s1750_s19 = smov 64   ;;  %s1751_s20 = smov 4  }
  0x1b   : > { %1197 = dma.hbm_to_vmem [thread:$0]  (!%p1602_p10), %s263_s16, 1024, %s265_s18, [#allocation9], %s1750_s19, %s1750_s19, %s1751_s20  }
  0x1c   : > { %s1628_s21 = sadd.s32 1, %s1499_s27   ;;  %s32_s23 = sadd.s32 1, %s1495_s26 }
  0x1d   : > { %s29_s22 = ssub.s32 %s1499_s27, %s1628_s21  ;;  %p39_p13 = scmp.ne.s32.totalorder %s1495_s26, %s1491_s25 }
  0x1e   : > { %p30_p12 = scmp.eq.s32.totalorder %s29_s22, 0  ;;  %p40_p0 = scmp.eq.s32.totalorder %s1499_s27, 0 }
  0x1f   : > { %p1641_p5 = por %p195_p2, %p39_p13  ;;  %p1210_p7 = scmp.lt.s32.totalorder %s1499_s27, 2 }
  0x20   : > { %s1637_s29 = scalar_select %p30_p12, %s1495_s26, %s32_s23  }
  0x21   : > { %p41_p3 = por %p40_p0, %p39_p13  ;;  %s281_s15 = sand.u32 1, %s1495_s26  }
  0x22   : > { %s939_s10 = sshll.u32 %s281_s15, 3  ;;  %s1122_s13 = sshll.u32 %s1499_s27, 3 }
  0x23   : > { %s290_s14 = scalar_lea.hbm %s1742_s0, %s1122_s13  ;;  %s285_s17 = scalar_lea.vmem [#allocation2], %s939_s10 }
  0x24   : > { %s293_s18 = sshll.u32 %s285_s17, 4  ;;  %s291_s22 = sshll.u32 %s290_s14, 4  ;;  %s294_s18 = int_to_ptr.vmem [resolvable:$true] %s293_s18  ;;  %s292_s22 = int_to_ptr.hbm [resolvable:$true] %s291_s22 }
  0x25   : > { %p1651_p9 = pnand %p1210_p7, %p41_p3  ;;  %s282_s19 = scalar_lea.sflag [#allocation3], %s281_s15 }
  0x26   : > { %s1395_s20 = sshra.s32 %s292_s22, 4  ;;  %s1402_s16 = scalar_lea.hbm %s1742_s0, 16  ;;  %s1396_s20 = int_to_ptr.hbm [resolvable:$true] %s1395_s20 }
  0x27   : > { %s1397_s1 = scalar_lea.hbm %s1396_s20, 8  ;;  %p1399_p10 = pneg %p1651_p9 }
  0x28   : > { %p1398_p2 = scmp.ne.s32.totalorder %s1396_s20, %s1397_s1  ;;  %p1403_p0 = scmp.lt.s32.totalorder %s1396_s20, %s1742_s0 }
  0x29   : > { %p1404_p3 = scmp.lt.s32.totalorder %s1402_s16, %s1397_s1 }
  0x2a   : > { %p1400_p12 = pnand %p1399_p10, %p1398_p2 }
  0x2b   : > { %p1405_p7 = por %p1404_p3, %p1403_p0 }
  0x2c   : > { %p1401_p13 = pneg %p1400_p12 }
  0x2e   : > { %p1406_p11 = pnand %p1405_p7, %p1401_p13 }
  0x30   : > { %1409 = shalt.err (!%p1406_p11)
}
  0x31   : > { %s1760_s15 = smov 4   ;;  %s1761_s17 = smov 64  }
  0x32   : > { %1201 = dma.hbm_to_vmem [thread:$0]  (!%p1651_p9), %s292_s22, 128, %s294_s18, %s282_s19, %s1761_s17, %s1761_s17, %s1760_s15  }
  0x33   : > { %305 = sbr.rel (%p1594_p8) target bundleno = 583 (0x247), region = 48  ;;  %s1671_s13 = sand.u32 (!%p1594_p8), 1, %s1491_s25  }
  0x34   : > { %s943_s20 = sshll.u32 (!%p1594_p8), %s1671_s13, 3  ;;  %s308_s1 = scalar_lea.sflag (!%p1594_p8), [#allocation3], %s1671_s13 }
  0x35   : > { %s1675_s10 = scalar_lea.vmem (!%p1594_p8), [#allocation2], %s943_s20 }
  0x38   : > { %1470 = dma.done.wait (%p1581_p4), %s308_s1, 128  }
  0x39   : > { %1472 = vsyncadd (%p1581_p4), %s308_s1, 4294967168 }
  0x3a   : > { %1474 = dma.done.wait (%p46_p1), [#allocation6], 2080  }
  0x3b   : > { %1476 = vsyncadd (%p46_p1), [#allocation6], 4294965216 }
  0x3c   : > { %1478 = dma.done.wait (%p46_p1), [#allocation9], 3072  }
  0x3d   : > { %1480 = vsyncadd (%p46_p1), [#allocation9], 4294964224  ;;  %v1011_v0 = vld [vmem:[#allocation5 + $0x70] sm:$0xf]  ;;  %v1139_v1 = vld [vmem:[#allocation5 + $0x74] sm:$0xf0] }
  0x3e   : > { %v1003_v2 = vld [vmem:[#allocation5 + $0x60] sm:$0xf]  ;;  %v1012_v3 = vor.u32 %v1139_v1, %v1011_v0  ;;  %v1137_v4 = vld [vmem:[#allocation5 + $0x64] sm:$0xf0]  ;;  %v995_v6 = vld [vmem:[#allocation5 + $0x50] sm:$0xf] }
  0x3f   : > { %v1004_v5 = vor.u32 %v1137_v4, %v1003_v2  ;;  %v1135_v7 = vld [vmem:[#allocation5 + $0x54] sm:$0xf0]  ;;  %v1138_v8 = vld [vmem:[#allocation5 + $0x74] sm:$0xf]  ;;  %v1013_v9 = vld [vmem:[#allocation5 + $0x78] sm:$0xf0] }
  0x40   : > { %475 = vmatpush.bf16.msra.mxu0 %v1012_v3  ;;  %v1016_v10 = vor.u32 %v1138_v8, %v1013_v9  ;;  %v1136_v11 = vld [vmem:[#allocation5 + $0x64] sm:$0xf]  ;;  %v1005_v12 = vld [vmem:[#allocation5 + $0x68] sm:$0xf0]  ;;  %v996_v13 = vor.u32 %v1135_v7, %v995_v6  ;;  %v987_v14 = vld [vmem:[#allocation5 + $0x40] sm:$0xf] }
  0x41   : > { %v1008_v15 = vor.u32 %v1136_v11, %v1005_v12  ;;  %v1133_v16 = vld [vmem:[#allocation5 + $0x44] sm:$0xf0]  ;;  %v1134_v17 = vld [vmem:[#allocation5 + $0x54] sm:$0xf]  ;;  %v997_v18 = vld [vmem:[#allocation5 + $0x58] sm:$0xf0] }
  0x42   : > { %489 = vmatpush.bf16.msra.mxu1 %v1016_v10  ;;  %v988_v19 = vor.u32 %v1133_v16, %v987_v14  ;;  %v979_v20 = vld [vmem:[#allocation5 + $0x30] sm:$0xf]  ;;  %v1000_v21 = vor.u32 %v1134_v17, %v997_v18  ;;  %v1131_v22 = vld [vmem:[#allocation5 + $0x34] sm:$0xf0]  ;;  %v1132_v23 = vld [vmem:[#allocation5 + $0x44] sm:$0xf] }
  0x43   : > { %v989_v24 = vld [vmem:[#allocation5 + $0x48] sm:$0xf0]  ;;  %v980_v25 = vor.u32 %v1131_v22, %v979_v20  ;;  %v971_v26 = vld [vmem:[#allocation5 + $0x20] sm:$0xf]  ;;  %v1129_v28 = vld [vmem:[#allocation5 + $0x24] sm:$0xf0] }
  0x44   : > { %476 = vmatpush.bf16.msra.mxu0 %v1004_v5  ;;  %v992_v27 = vor.u32 %v1132_v23, %v989_v24  ;;  %v1130_v29 = vld [vmem:[#allocation5 + $0x34] sm:$0xf]  ;;  %v981_v30 = vld [vmem:[#allocation5 + $0x38] sm:$0xf0]  ;;  %v972_v31 = vor.u32 %v1129_v28, %v971_v26  ;;  %v963_v32 = vld [vmem:[#allocation5 + $0x10] sm:$0xf] }
  0x45   : > { %v984_v33 = vor.u32 %v1130_v29, %v981_v30  ;;  %v1127_v34 = vld [vmem:[#allocation5 + $0x14] sm:$0xf0]  ;;  %v1128_v35 = vld [vmem:[#allocation5 + $0x24] sm:$0xf]  ;;  %v973_v36 = vld [vmem:[#allocation5 + $0x28] sm:$0xf0] }
  0x46   : > { %490 = vmatpush.bf16.msra.mxu1 %v1008_v15  ;;  %v964_v37 = vor.u32 %v1127_v34, %v963_v32  ;;  %v955_v38 = vld [vmem:[#allocation5] sm:$0xf]  ;;  %v976_v39 = vor.u32 %v1128_v35, %v973_v36  ;;  %v1125_v40 = vld [vmem:[#allocation5 + $0x4] sm:$0xf0]  ;;  %v1126_v41 = vld [vmem:[#allocation5 + $0x14] sm:$0xf] }
  0x47   : > { %v965_v42 = vld [vmem:[#allocation5 + $0x18] sm:$0xf0]  ;;  %v956_v43 = vor.u32 %v1125_v40, %v955_v38  ;;  %v1124_v45 = vld [vmem:[#allocation5 + $0x4] sm:$0xf]  ;;  %v957_v46 = vld [vmem:[#allocation5 + $0x8] sm:$0xf0] }
  0x48   : > { %477 = vmatpush.bf16.msra.mxu0 %v996_v13  ;;  %v968_v44 = vor.u32 %v1126_v41, %v965_v42  ;;  %v1123_v47 = vld [vmem:[%s1675_s10] sm:$0xff]  ;;  %v960_v48 = vor.u32 %v1124_v45, %v957_v46  ;;  %v1069_v55 = vld [vmem:[#allocation8 + $0x60] sm:$0xf]  ;;  %v1153_v56 = vld [vmem:[#allocation8 + $0x64] sm:$0xf0]  ;;  %s948_s19 = sshll.u32 %s1671_s13, 4 }
  0x49   : > { %v1077_v49 = vld [vmem:[#allocation8 + $0x70] sm:$0xf]  ;;  %v1155_v50 = vld [vmem:[#allocation8 + $0x74] sm:$0xf0]  ;;  %v1154_v51 = vld [vmem:[#allocation8 + $0x74] sm:$0xf]  ;;  %v1070_v58 = vor.u32 %v1153_v56, %v1069_v55 }
  0x4a   : > { %491 = vmatpush.bf16.msra.mxu1 %v1000_v21  ;;  %v1078_v52 = vor.u32 %v1155_v50, %v1077_v49  ;;  %v1079_v53 = vld [vmem:[#allocation8 + $0x78] sm:$0xf0]  ;;  %v1152_v57 = vld [vmem:[#allocation8 + $0x64] sm:$0xf]  ;;  %v1071_v59 = vld [vmem:[#allocation8 + $0x68] sm:$0xf0] }
  0x4b   : > { %v1082_v54 = vor.u32 %v1154_v51, %v1079_v53  ;;  %v1074_v60 = vor.u32 %v1152_v57, %v1071_v59  ;;  %v1061_v61 = vld [vmem:[#allocation8 + $0x50] sm:$0xf]  ;;  %v1151_v62 = vld [vmem:[#allocation8 + $0x54] sm:$0xf0]  ;;  %v1150_v63 = vld [vmem:[#allocation8 + $0x54] sm:$0xf] }
  0x4c   : > { %478 = vmatpush.bf16.msra.mxu0 %v988_v19  ;;  %648 = vmatpush.bf16.msra.mxu2 %v1078_v52  ;;  %v1062_v0 = vor.u32 %v1151_v62, %v1061_v61  ;;  %v1063_v1 = vld [vmem:[#allocation8 + $0x58] sm:$0xf0]  ;;  %v1053_v3 = vld [vmem:[#allocation8 + $0x40] sm:$0xf]  ;;  %v1149_v4 = vld [vmem:[#allocation8 + $0x44] sm:$0xf0] }
  0x4d   : > { %662 = vmatpush.bf16.msra.mxu3 %v1082_v54  ;;  %v1066_v2 = vor.u32 %v1150_v63, %v1063_v1  ;;  %v1148_v5 = vld [vmem:[#allocation8 + $0x44] sm:$0xf]  ;;  %v1054_v6 = vor.u32 %v1149_v4, %v1053_v3  ;;  %v1055_v7 = vld [vmem:[#allocation8 + $0x48] sm:$0xf0]  ;;  %v1690_v9 = vld [vmem:[#allocation7] sm:$0x3] }
  0x4e   : > { %492 = vmatpush.bf16.msra.mxu1 %v992_v27  ;;  %v1058_v8 = vor.u32 %v1148_v5, %v1055_v7  ;;  %v1045_v10 = vld [vmem:[#allocation8 + $0x30] sm:$0xf]  ;;  %v1147_v11 = vld [vmem:[#allocation8 + $0x34] sm:$0xf0]  ;;  %v1146_v12 = vld [vmem:[#allocation8 + $0x34] sm:$0xf] }
  0x4f   : > { %v1046_v13 = vor.u32 %v1147_v11, %v1045_v10  ;;  %v1047_v14 = vld [vmem:[#allocation8 + $0x38] sm:$0xf0]  ;;  %v385_v15 = vperm.slane %v1690_v9, 0  ;;  %v1037_v17 = vld [vmem:[#allocation8 + $0x20] sm:$0xf]  ;;  %v386_v59 = vperm.slane %v1690_v9, 1 }
  0x50   : > { %479 = vmatpush.bf16.msra.mxu0 %v980_v25  ;;  %649 = vmatpush.bf16.msra.mxu2 %v1070_v58  ;;  %v1050_v16 = vor.u32 %v1146_v12, %v1047_v14  ;;  %v1145_v18 = vld [vmem:[#allocation8 + $0x24] sm:$0xf0]  ;;  %v1144_v19 = vld [vmem:[#allocation8 + $0x24] sm:$0xf]  ;;  %v1039_v22 = vld [vmem:[#allocation8 + $0x28] sm:$0xf0] }
  0x51   : > { %663 = vmatpush.bf16.msra.mxu3 %v1074_v60  ;;  %v1038_v21 = vor.u32 %v1145_v18, %v1037_v17  ;;  %v1042_v24 = vor.u32 %v1144_v19, %v1039_v22  ;;  %v1029_v26 = vld [vmem:[#allocation8 + $0x10] sm:$0xf]  ;;  %v1143_v27 = vld [vmem:[#allocation8 + $0x14] sm:$0xf0]  ;;  %v1142_v29 = vld [vmem:[#allocation8 + $0x14] sm:$0xf] }
  0x52   : > { %493 = vmatpush.bf16.msra.mxu1 %v984_v33  ;;  %v1030_v28 = vor.u32 %v1143_v27, %v1029_v26  ;;  %v1031_v30 = vld [vmem:[#allocation8 + $0x18] sm:$0xf0]  ;;  %v1021_v32 = vld [vmem:[#allocation8] sm:$0xf]  ;;  %v1141_v33 = vld [vmem:[#allocation8 + $0x4] sm:$0xf0] }
  0x53   : > { %v1140_v34 = vld [vmem:[#allocation8 + $0x4] sm:$0xf]  ;;  %v1022_v36 = vor.u32 %v1141_v33, %v1021_v32  ;;  %v1163_v11 = vld [vmem:[#allocation10 + $0x38] sm:$0xff]  ;;  %v1162_v12 = vld [vmem:[#allocation10 + $0x30] sm:$0xff]  ;;  %s1164_s23 = sshll.u32 %s1572_s28, 4  ;;  %s362_s15 = scalar_lea.vmem [#allocation11], %s948_s19 }
  0x54   : > { %480 = vmatpush.bf16.msra.mxu0 %v972_v31  ;;  %650 = vmatpush.bf16.msra.mxu2 %v1062_v0  ;;  %v1034_v31 = vor.u32 %v1142_v29, %v1031_v30  ;;  %v561_v14 = vld [vmem:[%s1746_s4] sm:$0x3]  ;;  %v1159_v17 = vld [vmem:[#allocation10 + $0x18] sm:$0xff]  ;;  %s817_s14 = scalar_lea.hbm %s1749_s7, %s1164_s23  ;;  %s818_s17 = sshll.u32 %s362_s15, 4  ;;  %s819_s17 = int_to_ptr.vmem [resolvable:$true] %s818_s17 }
  0x55   : > { %664 = vmatpush.bf16.msra.mxu3 %v1066_v2  ;;  %v1157_v22 = vld [vmem:[#allocation10 + $0x8] sm:$0xff]  ;;  %s820_s20 = sshll.u32 %s817_s14, 4  ;;  %s806_s1 = scalar_lea.sflag [#allocation4], %s1671_s13  ;;  %s821_s20 = int_to_ptr.hbm [resolvable:$true] %s820_s20 }
  0x56   : > { %494 = vmatpush.bf16.msra.mxu1 %v976_v39  ;;  %s1439_s10 = sshra.s32 %s821_s20, 4  ;;  %s1445_s19 = scalar_lea.hbm %s1749_s7, 32  ;;  %s1440_s10 = int_to_ptr.hbm [resolvable:$true] %s1439_s10 }
  0x57   : > { %s1441_s28 = scalar_lea.hbm %s1440_s10, 16  ;;  %p1446_p11 = scmp.lt.s32.totalorder %s1440_s10, %s1749_s7 }
  0x58   : > { %481 = vmatpush.bf16.msra.mxu0 %v964_v37  ;;  %651 = vmatpush.bf16.msra.mxu2 %v1054_v6  ;;  %v1023_v37 = vld [vmem:[#allocation8 + $0x8] sm:$0xf0]  ;;  %p1442_p1 = scmp.ne.s32.totalorder %s1440_s10, %s1441_s28  ;;  %p1447_p9 = scmp.lt.s32.totalorder %s1445_s19, %s1441_s28 }
  0x59   : > { %665 = vmatpush.bf16.msra.mxu3 %v1058_v8  ;;  %v1026_v39 = vor.u32 %v1140_v34, %v1023_v37 }
  0x5a   : > { %495 = vmatpush.bf16.msra.mxu1 %v968_v44  ;;  %p1443_p4 = pnand %p1442_p1, %p1641_p5  ;;  %p1448_p2 = por %p1447_p9, %p1446_p11 }
  0x5c   : > { %482 = vmatpush.bf16.msra.mxu0 %v956_v43  ;;  %652 = vmatpush.bf16.msra.mxu2 %v1046_v13  ;;  %v1161_v13 = vld [vmem:[#allocation10 + $0x28] sm:$0xff]  ;;  %p1444_p8 = pneg %p1443_p4 }
  0x5d   : > { %666 = vmatpush.bf16.msra.mxu3 %v1050_v16  ;;  %v564_v16 = vperm.slane %v561_v14, 0 }
  0x5e   : > { %496 = vmatpush.bf16.msra.mxu1 %v960_v48  ;;  %p1449_p10 = pnand %p1448_p2, %p1444_p8 }
  0x5f   : > { %483 = vmatmul.bf16.vlgmr.msra.gmra.mxu0 %v1123_v47 }
  0x60   : > { %653 = vmatpush.bf16.msra.mxu2 %v1038_v21  ;;  %789 = vmatpush.bf16.msrb.mxu0 %v1163_v11 }
  0x61   : > { %497 = vmatmul.bf16.vlgmr.msra.gmra.mxu1 %v1123_v47  ;;  %667 = vmatpush.bf16.msra.mxu3 %v1042_v24 }
  0x64   : > { %654 = vmatpush.bf16.msra.mxu2 %v1030_v28  ;;  %790 = vmatpush.bf16.msrb.mxu0 %v1162_v12 }
  0x65   : > { %668 = vmatpush.bf16.msra.mxu3 %v1034_v31 }
  0x68   : > { %655 = vmatpush.bf16.msra.mxu2 %v1022_v36  ;;  %791 = vmatpush.bf16.msrb.mxu0 %v1161_v13 }
  0x69   : > { %669 = vmatpush.bf16.msra.mxu3 %v1026_v39 }
  0xdc   : > { %v484_v20 = vpop.f32.mrf.mxu0 }
  0xdd   : > { %v485_v23 = vadd.f32 %v484_v20, %v385_v15  ;;  %v1158_v20 = vld [vmem:[#allocation10 + $0x10] sm:$0xff] }
  0xde   : > { %v498_v49 = vpop.f32.mrf.mxu1 }
  0xdf   : > { %v1017_v25 = vmul.f32 -1.442695, %v485_v23  ;;  %v499_v4 = vadd.f32 %v498_v49, %v386_v59 }
  0xe1   : > { %1259 = vpow2.f32 %v1017_v25  ;;  %v1156_v25 = vld [vmem:[#allocation10] sm:$0xff] }
  0xe4   : > { %v486_v35 = vpop.f32.mrf.mxu0 }
  0xe5   : > { %v487_v38 = vadd.f32 %v486_v35, %v385_v15  ;;  %v1160_v15 = vld [vmem:[#allocation10 + $0x20] sm:$0xff] }
  0xe6   : > { %v500_v1 = vpop.f32.mrf.mxu1  ;;  %792 = vmatpush.bf16.msrb.mxu0 %v1160_v15 }
  0xe7   : > { %v1260_v40 = vpop.eup %1259  ;;  %v1018_v41 = vmul.f32 -1.442695, %v487_v38  ;;  %v501_v7 = vadd.f32 %v500_v1, %v386_v59 }
  0xe8   : > { %v509_v42 = vadd.f32 1.0, %v1260_v40 }
  0xe9   : > { %1261 = vpow2.f32 %v1018_v41 }
  0xea   : > { %1263 = vrcp.f32 %v509_v42  ;;  %v522_v52 = vand.u32 2147483648, %v509_v42  ;;  %vm516_vm1 = vweird.f32 %v509_v42  ;;  %v520_v53 = vand.u32 2147483647, %v509_v42  ;;  %793 = vmatpush.bf16.msrb.mxu0 %v1159_v17 }
  0xec   : > { %v523_v57 = vor.u32 1.1754944e-38, %v522_v52  ;;  %vm521_vm3 = vcmp.eq.f32.partialorder %v520_v53, 8.507059e+37 }
  0xee   : > { %794 = vmatpush.bf16.msrb.mxu0 %v1158_v20 }
  0xef   : > { %v1262_v43 = vpop.eup %1261 }
  0xf0   : > { %v1264_v44 = vpop.eup %1263  ;;  %v510_v45 = vadd.f32 1.0, %v1262_v43 }
  0xf1   : > { %v512_v46 = vmul.f32 %v1264_v44, %v509_v42  ;;  %vm517_vm0 = vweird.f32 %v1264_v44 }
  0xf2   : > { %1265 = vrcp.f32 %v510_v45  ;;  %vm518_vm2 = vmor %vm516_vm1, %vm517_vm0  ;;  %v537_v58 = vand.u32 2147483648, %v510_v45  ;;  %v535_v61 = vand.u32 2147483647, %v510_v45  ;;  %vm531_vm5 = vweird.f32 %v510_v45  ;;  %795 = vmatpush.bf16.msrb.mxu0 %v1157_v22 }
  0xf3   : > { %v513_v47 = vsub.f32 1.0, %v512_v46  ;;  %v565_v46 = vperm.slane %v561_v14, 1 }
  0xf4   : > { %v538_v0 = vor.u32 1.1754944e-38, %v537_v58  ;;  %vm536_vm7 = vcmp.eq.f32.partialorder %v535_v61, 8.507059e+37 }
  0xf5   : > { %v514_v48 = vmul.f32 %v1264_v44, %v513_v47 }
  0xf6   : > { %796 = vmatpush.bf16.msrb.mxu0 %v1156_v25 }
  0xf7   : > { %v515_v50 = vadd.f32 %v1264_v44, %v514_v48 }
  0xf8   : > { %v1266_v51 = vpop.eup %1265 }
  0xf9   : > { %v527_v54 = vmul.f32 %v1266_v51, %v510_v45  ;;  %v519_v55 = vsel %vm518_vm2, %v1264_v44, %v515_v50  ;;  %vm532_vm4 = vweird.f32 %v1266_v51 }
  0xfa   : > { %v524_v62 = vsel %vm521_vm3, %v523_v57, %v519_v55  ;;  %vm533_vm6 = vmor %vm531_vm5, %vm532_vm4 }
  0xfb   : > { %v528_v56 = vsub.f32 1.0, %v527_v54  ;;  %v541_v2 = vmul.f32 %v524_v62, %v485_v23 }
  0xfd   : > { %v529_v60 = vmul.f32 %v1266_v51, %v528_v56  ;;  %v1694_v8 = vmul.f32 %v541_v2, %v499_v4 }
  0xff   : > { %v530_v63 = vadd.f32 %v1266_v51, %v529_v60 }
 0x101   : > { %v534_v3 = vsel %vm533_vm6, %v1266_v51, %v530_v63  ;;  %v1258_v63 = vld [vmem:[%s1748_s6] ss:$0 sm:$0xff] }
 0x102   : > { %v539_v5 = vsel %vm536_vm7, %v538_v0, %v534_v3 }
 0x103   : > { %v542_v6 = vmul.f32 %v539_v5, %v487_v38 }
 0x105   : > { %v1696_v9 = vmul.f32 %v542_v6, %v501_v7 }
 0x107   : > { %v562_v10 = vpack.c.bf16 %v1696_v9, %v1694_v8 }
 0x109   : > { %656 = vmatmul.bf16.vlgmr.msra.gmra.mxu2 %v562_v10  ;;  %670 = vmatmul.bf16.vlgmr.msra.gmra.mxu3 %v562_v10 }
 0x18c   : > { %v657_v18 = vpop.f32.mrf.mxu2  ;;  %v671_v36 = vpop.f32.mrf.mxu3 }
 0x18d   : > { %v658_v19 = vadd.f32 %v657_v18, %v564_v16  ;;  %v672_v53 = vadd.f32 %v671_v36, %v565_v46 }
 0x18f   : > { %v1083_v21 = vmul.f32 -1.442695, %v658_v19 }
 0x191   : > { %1267 = vpow2.f32 %v1083_v21 }
 0x194   : > { %v659_v23 = vpop.f32.mrf.mxu2  ;;  %v673_v52 = vpop.f32.mrf.mxu3 }
 0x195   : > { %v660_v24 = vadd.f32 %v659_v23, %v564_v16  ;;  %v674_v58 = vadd.f32 %v673_v52, %v565_v46 }
 0x197   : > { %v1268_v26 = vpop.eup %1267  ;;  %v1084_v27 = vmul.f32 -1.442695, %v660_v24 }
 0x198   : > { %v682_v28 = vadd.f32 1.0, %v1268_v26 }
 0x199   : > { %1269 = vpow2.f32 %v1084_v27 }
 0x19a   : > { %1271 = vrcp.f32 %v682_v28  ;;  %v695_v35 = vand.u32 2147483648, %v682_v28  ;;  %vm689_vm9 = vweird.f32 %v682_v28  ;;  %v693_v38 = vand.u32 2147483647, %v682_v28 }
 0x19c   : > { %v696_v42 = vor.u32 1.1754944e-38, %v695_v35  ;;  %vm694_vm11 = vcmp.eq.f32.partialorder %v693_v38, 8.507059e+37 }
 0x19f   : > { %v1270_v29 = vpop.eup %1269 }
 0x1a0   : > { %v1272_v30 = vpop.eup %1271  ;;  %v683_v31 = vadd.f32 1.0, %v1270_v29 }
 0x1a1   : > { %v685_v32 = vmul.f32 %v1272_v30, %v682_v28  ;;  %vm690_vm8 = vweird.f32 %v1272_v30 }
 0x1a2   : > { %1273 = vrcp.f32 %v683_v31  ;;  %vm691_vm10 = vmor %vm689_vm9, %vm690_vm8  ;;  %v710_v45 = vand.u32 2147483648, %v683_v31  ;;  %v708_v48 = vand.u32 2147483647, %v683_v31  ;;  %vm704_vm13 = vweird.f32 %v683_v31 }
 0x1a3   : > { %v686_v33 = vsub.f32 1.0, %v685_v32 }
 0x1a4   : > { %v711_v51 = vor.u32 1.1754944e-38, %v710_v45  ;;  %vm709_vm15 = vcmp.eq.f32.partialorder %v708_v48, 8.507059e+37 }
 0x1a5   : > { %v687_v34 = vmul.f32 %v1272_v30, %v686_v33 }
 0x1a7   : > { %v688_v37 = vadd.f32 %v1272_v30, %v687_v34 }
 0x1a8   : > { %v1274_v39 = vpop.eup %1273 }
 0x1a9   : > { %v692_v40 = vsel %vm691_vm10, %v1272_v30, %v688_v37  ;;  %v700_v41 = vmul.f32 %v1274_v39, %v683_v31  ;;  %vm705_vm12 = vweird.f32 %v1274_v39 }
 0x1aa   : > { %v697_v44 = vsel %vm694_vm11, %v696_v42, %v692_v40  ;;  %vm706_vm14 = vmor %vm704_vm13, %vm705_vm12 }
 0x1ab   : > { %v701_v43 = vsub.f32 1.0, %v700_v41  ;;  %v714_v49 = vmul.f32 %v697_v44, %v658_v19 }
 0x1ad   : > { %v702_v47 = vmul.f32 %v1274_v39, %v701_v43  ;;  %v716_v56 = vmul.f32 %v714_v49, %v672_v53 }
 0x1af   : > { %v703_v50 = vadd.f32 %v1274_v39, %v702_v47  ;;  %v718_v60 = vadd.f32 %v716_v56, %v1694_v8 }
 0x1b1   : > { %v707_v54 = vsel %vm706_vm14, %v1274_v39, %v703_v50 }
 0x1b2   : > { %v712_v55 = vsel %vm709_vm15, %v711_v51, %v707_v54 }
 0x1b3   : > { %v715_v57 = vmul.f32 %v712_v55, %v660_v24 }
 0x1b5   : > { %v717_v59 = vmul.f32 %v715_v57, %v674_v58 }
 0x1b7   : > { %v719_v61 = vadd.f32 %v717_v59, %v1696_v9 }
 0x1b9   : > { %v737_v62 = vpack.c.bf16 %v719_v61, %v718_v60 }
 0x1bb   : > { %797 = vmatmul.bf16.vlgmr.msrb.gmra.mxu0 %v737_v62 }
 0x238   : > { %v798_v0 = vpop.f32.mrf.mxu0 }
 0x239   : > { %v799_v1 = vadd.f32 %v1258_v63, %v798_v0 }
 0x23b   : > { %803 = vst [vmem:[%s362_s15] sm:$0xff] %v799_v1 }
 0x240   : > { %v800_v2 = vpop.f32.mrf.mxu0 }
 0x241   : > { %v801_v3 = vadd.f32 %v1258_v63, %v800_v2 }
 0x243   : > { %804 = vst [vmem:[%s362_s15 + $0x8] sm:$0xff] %v801_v3 }
 0x244   : > { %1452 = shalt.err (!%p1449_p10)
}
 0x245   : > { %s1509_s13 = smov 128   ;;  %s1510_s23 = smov 8  }
 0x246   : > { %1183 = dma.vmem_to_hbm [thread:$0]  (%p1641_p5), %s819_s17, 256, %s821_s20, %s806_s1, %s1509_s13, %s1509_s13, %s1510_s23  }
 0x247 PF: > { %s835_s16 = sand.u32 1, %s1487_s24   ;;  %p1762_p12 = scmp.ge.s32.totalorder %s1499_s27, 2 }
 0x248   : > { %s836_s11 = scalar_lea.sflag [#allocation4], %s835_s16 }
 0x249   : > { %p1203_p13 = pnand %p1762_p12, %p1586_p6 }
 0x24b   : > { %p1204_p0 = pneg %p1203_p13 }
 0x24d   : > { %1482 = dma.done.wait (%p1204_p0), %s836_s11, 256  }
 0x24e   : > { %1484 = vsyncadd (%p1204_p0), %s836_s11, 4294967040  ;;  %p22_p3 = scmp.ge.s32.totalorder %s1628_s21, 4   ;;  %s1763_s24 = smov %s1491_s25 }
 0x24f   : > { %s1764_s25 = smov %s1495_s26  ;;  %s1765_s26 = smov %s1637_s29 }
 0x250   : > { %s1766_s27 = smov %s1628_s21  ;;  %24 = sbr.rel (!%p22_p3) target bundleno = 9 (0x9), region = 109 }
 0x255   :  { %842 = vsyncpa [#allocation3], 1 }
 0x256   :  { %844 = vsyncpa [#allocation3 + $0x1], 1 }
 0x257   :  { %845 = vsyncpa [#allocation6], 1 }
 0x258   :  { %846 = vsyncpa [#allocation9], 1 }
 0x259   :  { %847 = vsyncpa [#allocation4], 1 }
 0x25a   :  { %849 = vsyncpa [#allocation4 + $0x1], 1 }

// kernel: tpu_custom_call.1
= control target key start
LH: loop header
LB: loop body
LE: loop exit
PB: predicated region body
PF: predicated region fallthrough
CT: control target
= control target key end

     0   :  { %s1742_s0 = inlined_call_operand.hbm [shape: bf16[32,128], index: 0, kind: input, shape index: {}]   ;;  %s1743_s1 = inlined_call_operand.hbm [shape: bf16[128,256], index: 1, kind: input, shape index: {}]   ;;  %s1744_s2 = inlined_call_operand.hbm [shape: f32[1,256], index: 2, kind: input, shape index: {}]   ;;  %s1745_s3 = inlined_call_operand.hbm [shape: bf16[128,256], index: 3, kind: input, shape index: {}]   ;;  %s1746_s4 = inlined_call_operand.vmem [shape: f32[1,256], index: 4, kind: input, shape index: {}]   ;;  %s1747_s5 = inlined_call_operand.hbm [shape: bf16[128,128], index: 5, kind: input, shape index: {}]   ;;  %s1748_s6 = inlined_call_operand.vmem [shape: f32[1,128], index: 6, kind: input, shape index: {}]   ;;  %s1749_s7 = inlined_call_operand.hbm [shape: f32[32,128], index: 7, kind: output, shape index: {}]  }
   0x1   :  { %1752 = sst [smem:[#allocation16_spill]] %s1743_s1 }
   0x2   :  { %12 = vsyncpa [#allocation3], 0 }
   0x3   :  { %14 = vsyncpa [#allocation3 + $0x1], 0 }
   0x4   :  { %15 = vsyncpa [#allocation6], 0 }
   0x5   :  { %16 = vsyncpa [#allocation9], 0 }
   0x6   :  { %17 = vsyncpa [#allocation4], 0 }
   0x7   :  { %19 = vsyncpa [#allocation4 + $0x1], 0  ;;  %s1551_s24 = smov 0   ;;  %s1553_s25 = smov 0  }
   0x8   :  { %s1555_s26 = smov 0   ;;  %s1557_s27 = smov 0  }
   0x9 LB: > { %s1572_s28 = sadd.s32 4294967295, %s1499_s27   ;;  %s932_s29 = sadd.s32 4294967294, %s1499_s27   ;;  %s1499_s27 = sphi %s1557_s27, %s1766_s27   ;;  %s1495_s26 = sphi %s1555_s26, %s1765_s26   ;;  %s1491_s25 = sphi %s1553_s25, %s1764_s25   ;;  %s1487_s24 = sphi %s1551_s24, %s1763_s24  }
   0xa   : > { %p45_p0 = scmp.ne.s32.totalorder %s1491_s25, %s1487_s24  ;;  %p46_p1 = scmp.eq.s32.totalorder %s1572_s28, 0 }
   0xb   : > { %p195_p2 = scmp.eq.s32.totalorder %s1572_s28, 1  ;;  %p201_p3 = scmp.eq.s32.totalorder %s932_s29, 1 }
   0xc   : > { %p1581_p4 = por %p46_p1, %p45_p0  ;;  %p933_p5 = scmp.ge.s32.totalorder %s1499_s27, 1 }
   0xd   : > { %p1586_p6 = por %p201_p3, %p45_p0  ;;  %p208_p7 = scmp.lt.s32.totalorder %s1499_s27, 3 }
   0xe   : > { %s1755_s1 = sld [smem:[#allocation16_spill]]  ;;  %s1501_s13 = smov [#allocation5]  }
   0xf   : > { %p1594_p8 = pnand %p933_p5, %p208_p7  ;;  %s221_s14 = sshll.u32 %s1501_s13, 4  ;;  %s222_s14 = int_to_ptr.vmem [resolvable:$true] %s221_s14 }
  0x10   : > { %s245_s18 = sshll.u32 %s1745_s3, 4  ;;  %s1502_s19 = smov 128   ;;  %s246_s18 = int_to_ptr.hbm [resolvable:$true] %s245_s18 }
  0x11   : > { %p1185_p9 = pneg %p1594_p8  ;;  %s1503_s20 = smov 8  }
  0x12   : > { %s1504_s21 = smov [#allocation8]   ;;  %s234_s9 = sshll.u32 %s1744_s2, 4  ;;  %s235_s9 = int_to_ptr.hbm [resolvable:$true] %s234_s9 }
  0x13   : > { %p1602_p10 = pnand %p1185_p9, %p46_p1  ;;  %s247_s22 = sshll.u32 %s1504_s21, 4  ;;  %s248_s22 = int_to_ptr.vmem [resolvable:$true] %s247_s22 }
  0x14   : > { %s219_s11 = sshll.u32 %s1755_s1, 4  ;;  %s262_s16 = sshll.u32 %s1747_s5, 4  ;;  %s220_s11 = int_to_ptr.hbm [resolvable:$true] %s219_s11  ;;  %s263_s16 = int_to_ptr.hbm [resolvable:$true] %s262_s16 }
  0x15   : > { %1188 = dma.hbm_to_vmem [thread:$0]  (!%p1602_p10), %s220_s11, 2048, %s222_s14, [#allocation6], %s1502_s19, %s1502_s19, %s1503_s20  }
  0x16   : > { %1194 = dma.hbm_to_vmem [thread:$0]  (!%p1602_p10), %s246_s18, 2048, %s248_s22, [#allocation9], %s1502_s19, %s1502_s19, %s1503_s20  }
  0x17   : > { %s1505_s11 = smov [#allocation7]   ;;  %s1506_s17 = smov [#allocation10]  }
  0x18   : > { %s236_s14 = sshll.u32 %s1505_s11, 4  ;;  %s264_s18 = sshll.u32 %s1506_s17, 4  ;;  %s237_s14 = int_to_ptr.vmem [resolvable:$true] %s236_s14  ;;  %s265_s18 = int_to_ptr.vmem [resolvable:$true] %s264_s18 }
  0x19   : > { %1191 = dma.hbm_to_vmem [thread:$0]  (!%p1602_p10), %s235_s9, 32, %s237_s14, [#allocation6]  }
  0x1a   : > { %s1750_s19 = smov 64   ;;  %s1751_s20 = smov 4  }
  0x1b   : > { %1197 = dma.hbm_to_vmem [thread:$0]  (!%p1602_p10), %s263_s16, 1024, %s265_s18, [#allocation9], %s1750_s19, %s1750_s19, %s1751_s20  }
  0x1c   : > { %s1628_s21 = sadd.s32 1, %s1499_s27   ;;  %s32_s23 = sadd.s32 1, %s1495_s26 }
  0x1d   : > { %s29_s22 = ssub.s32 %s1499_s27, %s1628_s21  ;;  %p39_p13 = scmp.ne.s32.totalorder %s1495_s26, %s1491_s25 }
  0x1e   : > { %p30_p12 = scmp.eq.s32.totalorder %s29_s22, 0  ;;  %p40_p0 = scmp.eq.s32.totalorder %s1499_s27, 0 }
  0x1f   : > { %p1641_p5 = por %p195_p2, %p39_p13  ;;  %p1210_p7 = scmp.lt.s32.totalorder %s1499_s27, 2 }
  0x20   : > { %s1637_s29 = scalar_select %p30_p12, %s1495_s26, %s32_s23  }
  0x21   : > { %p41_p3 = por %p40_p0, %p39_p13  ;;  %s281_s15 = sand.u32 1, %s1495_s26  }
  0x22   : > { %s939_s10 = sshll.u32 %s281_s15, 3  ;;  %s1122_s13 = sshll.u32 %s1499_s27, 3 }
  0x23   : > { %s290_s14 = scalar_lea.hbm %s1742_s0, %s1122_s13  ;;  %s285_s17 = scalar_lea.vmem [#allocation2], %s939_s10 }
  0x24   : > { %s293_s18 = sshll.u32 %s285_s17, 4  ;;  %s291_s22 = sshll.u32 %s290_s14, 4  ;;  %s294_s18 = int_to_ptr.vmem [resolvable:$true] %s293_s18  ;;  %s292_s22 = int_to_ptr.hbm [resolvable:$true] %s291_s22 }
  0x25   : > { %p1651_p9 = pnand %p1210_p7, %p41_p3  ;;  %s282_s19 = scalar_lea.sflag [#allocation3], %s281_s15 }
  0x26   : > { %s1395_s20 = sshra.s32 %s292_s22, 4  ;;  %s1402_s16 = scalar_lea.hbm %s1742_s0, 16  ;;  %s1396_s20 = int_to_ptr.hbm [resolvable:$true] %s1395_s20 }
  0x27   : > { %s1397_s1 = scalar_lea.hbm %s1396_s20, 8  ;;  %p1399_p10 = pneg %p1651_p9 }
  0x28   : > { %p1398_p2 = scmp.ne.s32.totalorder %s1396_s20, %s1397_s1  ;;  %p1403_p0 = scmp.lt.s32.totalorder %s1396_s20, %s1742_s0 }
  0x29   : > { %p1404_p3 = scmp.lt.s32.totalorder %s1402_s16, %s1397_s1 }
  0x2a   : > { %p1400_p12 = pnand %p1399_p10, %p1398_p2 }
  0x2b   : > { %p1405_p7 = por %p1404_p3, %p1403_p0 }
  0x2c   : > { %p1401_p13 = pneg %p1400_p12 }
  0x2e   : > { %p1406_p11 = pnand %p1405_p7, %p1401_p13 }
  0x30   : > { %1409 = shalt.err (!%p1406_p11)
}
  0x31   : > { %s1760_s15 = smov 4   ;;  %s1761_s17 = smov 64  }
  0x32   : > { %1201 = dma.hbm_to_vmem [thread:$0]  (!%p1651_p9), %s292_s22, 128, %s294_s18, %s282_s19, %s1761_s17, %s1761_s17, %s1760_s15  }
  0x33   : > { %305 = sbr.rel (%p1594_p8) target bundleno = 583 (0x247), region = 48  ;;  %s1671_s13 = sand.u32 (!%p1594_p8), 1, %s1491_s25  }
  0x34   : > { %s943_s20 = sshll.u32 (!%p1594_p8), %s1671_s13, 3  ;;  %s308_s1 = scalar_lea.sflag (!%p1594_p8), [#allocation3], %s1671_s13 }
  0x35   : > { %s1675_s10 = scalar_lea.vmem (!%p1594_p8), [#allocation2], %s943_s20 }
  0x38   : > { %1470 = dma.done.wait (%p1581_p4), %s308_s1, 128  }
  0x39   : > { %1472 = vsyncadd (%p1581_p4), %s308_s1, 4294967168 }
  0x3a   : > { %1474 = dma.done.wait (%p46_p1), [#allocation6], 2080  }
  0x3b   : > { %1476 = vsyncadd (%p46_p1), [#allocation6], 4294965216 }
  0x3c   : > { %1478 = dma.done.wait (%p46_p1), [#allocation9], 3072  }
  0x3d   : > { %1480 = vsyncadd (%p46_p1), [#allocation9], 4294964224  ;;  %v1011_v0 = vld [vmem:[#allocation5 + $0x70] sm:$0xf]  ;;  %v1139_v1 = vld [vmem:[#allocation5 + $0x74] sm:$0xf0] }
  0x3e   : > { %v1003_v2 = vld [vmem:[#allocation5 + $0x60] sm:$0xf]  ;;  %v1012_v3 = vor.u32 %v1139_v1, %v1011_v0  ;;  %v1137_v4 = vld [vmem:[#allocation5 + $0x64] sm:$0xf0]  ;;  %v995_v6 = vld [vmem:[#allocation5 + $0x50] sm:$0xf] }
  0x3f   : > { %v1004_v5 = vor.u32 %v1137_v4, %v1003_v2  ;;  %v1135_v7 = vld [vmem:[#allocation5 + $0x54] sm:$0xf0]  ;;  %v1138_v8 = vld [vmem:[#allocation5 + $0x74] sm:$0xf]  ;;  %v1013_v9 = vld [vmem:[#allocation5 + $0x78] sm:$0xf0] }
  0x40   : > { %475 = vmatpush.bf16.msra.mxu0 %v1012_v3  ;;  %v1016_v10 = vor.u32 %v1138_v8, %v1013_v9  ;;  %v1136_v11 = vld [vmem:[#allocation5 + $0x64] sm:$0xf]  ;;  %v1005_v12 = vld [vmem:[#allocation5 + $0x68] sm:$0xf0]  ;;  %v996_v13 = vor.u32 %v1135_v7, %v995_v6  ;;  %v987_v14 = vld [vmem:[#allocation5 + $0x40] sm:$0xf] }
  0x41   : > { %v1008_v15 = vor.u32 %v1136_v11, %v1005_v12  ;;  %v1133_v16 = vld [vmem:[#allocation5 + $0x44] sm:$0xf0]  ;;  %v1134_v17 = vld [vmem:[#allocation5 + $0x54] sm:$0xf]  ;;  %v997_v18 = vld [vmem:[#allocation5 + $0x58] sm:$0xf0] }
  0x42   : > { %489 = vmatpush.bf16.msra.mxu1 %v1016_v10  ;;  %v988_v19 = vor.u32 %v1133_v16, %v987_v14  ;;  %v979_v20 = vld [vmem:[#allocation5 + $0x30] sm:$0xf]  ;;  %v1000_v21 = vor.u32 %v1134_v17, %v997_v18  ;;  %v1131_v22 = vld [vmem:[#allocation5 + $0x34] sm:$0xf0]  ;;  %v1132_v23 = vld [vmem:[#allocation5 + $0x44] sm:$0xf] }
  0x43   : > { %v989_v24 = vld [vmem:[#allocation5 + $0x48] sm:$0xf0]  ;;  %v980_v25 = vor.u32 %v1131_v22, %v979_v20  ;;  %v971_v26 = vld [vmem:[#allocation5 + $0x20] sm:$0xf]  ;;  %v1129_v28 = vld [vmem:[#allocation5 + $0x24] sm:$0xf0] }
  0x44   : > { %476 = vmatpush.bf16.msra.mxu0 %v1004_v5  ;;  %v992_v27 = vor.u32 %v1132_v23, %v989_v24  ;;  %v1130_v29 = vld [vmem:[#allocation5 + $0x34] sm:$0xf]  ;;  %v981_v30 = vld [vmem:[#allocation5 + $0x38] sm:$0xf0]  ;;  %v972_v31 = vor.u32 %v1129_v28, %v971_v26  ;;  %v963_v32 = vld [vmem:[#allocation5 + $0x10] sm:$0xf] }
  0x45   : > { %v984_v33 = vor.u32 %v1130_v29, %v981_v30  ;;  %v1127_v34 = vld [vmem:[#allocation5 + $0x14] sm:$0xf0]  ;;  %v1128_v35 = vld [vmem:[#allocation5 + $0x24] sm:$0xf]  ;;  %v973_v36 = vld [vmem:[#allocation5 + $0x28] sm:$0xf0] }
  0x46   : > { %490 = vmatpush.bf16.msra.mxu1 %v1008_v15  ;;  %v964_v37 = vor.u32 %v1127_v34, %v963_v32  ;;  %v955_v38 = vld [vmem:[#allocation5] sm:$0xf]  ;;  %v976_v39 = vor.u32 %v1128_v35, %v973_v36  ;;  %v1125_v40 = vld [vmem:[#allocation5 + $0x4] sm:$0xf0]  ;;  %v1126_v41 = vld [vmem:[#allocation5 + $0x14] sm:$0xf] }
  0x47   : > { %v965_v42 = vld [vmem:[#allocation5 + $0x18] sm:$0xf0]  ;;  %v956_v43 = vor.u32 %v1125_v40, %v955_v38  ;;  %v1124_v45 = vld [vmem:[#allocation5 + $0x4] sm:$0xf]  ;;  %v957_v46 = vld [vmem:[#allocation5 + $0x8] sm:$0xf0] }
  0x48   : > { %477 = vmatpush.bf16.msra.mxu0 %v996_v13  ;;  %v968_v44 = vor.u32 %v1126_v41, %v965_v42  ;;  %v1123_v47 = vld [vmem:[%s1675_s10] sm:$0xff]  ;;  %v960_v48 = vor.u32 %v1124_v45, %v957_v46  ;;  %v1069_v55 = vld [vmem:[#allocation8 + $0x60] sm:$0xf]  ;;  %v1153_v56 = vld [vmem:[#allocation8 + $0x64] sm:$0xf0]  ;;  %s948_s19 = sshll.u32 %s1671_s13, 4 }
  0x49   : > { %v1077_v49 = vld [vmem:[#allocation8 + $0x70] sm:$0xf]  ;;  %v1155_v50 = vld [vmem:[#allocation8 + $0x74] sm:$0xf0]  ;;  %v1154_v51 = vld [vmem:[#allocation8 + $0x74] sm:$0xf]  ;;  %v1070_v58 = vor.u32 %v1153_v56, %v1069_v55 }
  0x4a   : > { %491 = vmatpush.bf16.msra.mxu1 %v1000_v21  ;;  %v1078_v52 = vor.u32 %v1155_v50, %v1077_v49  ;;  %v1079_v53 = vld [vmem:[#allocation8 + $0x78] sm:$0xf0]  ;;  %v1152_v57 = vld [vmem:[#allocation8 + $0x64] sm:$0xf]  ;;  %v1071_v59 = vld [vmem:[#allocation8 + $0x68] sm:$0xf0] }
  0x4b   : > { %v1082_v54 = vor.u32 %v1154_v51, %v1079_v53  ;;  %v1074_v60 = vor.u32 %v1152_v57, %v1071_v59  ;;  %v1061_v61 = vld [vmem:[#allocation8 + $0x50] sm:$0xf]  ;;  %v1151_v62 = vld [vmem:[#allocation8 + $0x54] sm:$0xf0]  ;;  %v1150_v63 = vld [vmem:[#allocation8 + $0x54] sm:$0xf] }
  0x4c   : > { %478 = vmatpush.bf16.msra.mxu0 %v988_v19  ;;  %648 = vmatpush.bf16.msra.mxu2 %v1078_v52  ;;  %v1062_v0 = vor.u32 %v1151_v62, %v1061_v61  ;;  %v1063_v1 = vld [vmem:[#allocation8 + $0x58] sm:$0xf0]  ;;  %v1053_v3 = vld [vmem:[#allocation8 + $0x40] sm:$0xf]  ;;  %v1149_v4 = vld [vmem:[#allocation8 + $0x44] sm:$0xf0] }
  0x4d   : > { %662 = vmatpush.bf16.msra.mxu3 %v1082_v54  ;;  %v1066_v2 = vor.u32 %v1150_v63, %v1063_v1  ;;  %v1148_v5 = vld [vmem:[#allocation8 + $0x44] sm:$0xf]  ;;  %v1054_v6 = vor.u32 %v1149_v4, %v1053_v3  ;;  %v1055_v7 = vld [vmem:[#allocation8 + $0x48] sm:$0xf0]  ;;  %v1690_v9 = vld [vmem:[#allocation7] sm:$0x3] }
  0x4e   : > { %492 = vmatpush.bf16.msra.mxu1 %v992_v27  ;;  %v1058_v8 = vor.u32 %v1148_v5, %v1055_v7  ;;  %v1045_v10 = vld [vmem:[#allocation8 + $0x30] sm:$0xf]  ;;  %v1147_v11 = vld [vmem:[#allocation8 + $0x34] sm:$0xf0]  ;;  %v1146_v12 = vld [vmem:[#allocation8 + $0x34] sm:$0xf] }
  0x4f   : > { %v1046_v13 = vor.u32 %v1147_v11, %v1045_v10  ;;  %v1047_v14 = vld [vmem:[#allocation8 + $0x38] sm:$0xf0]  ;;  %v385_v15 = vperm.slane %v1690_v9, 0  ;;  %v1037_v17 = vld [vmem:[#allocation8 + $0x20] sm:$0xf]  ;;  %v386_v59 = vperm.slane %v1690_v9, 1 }
  0x50   : > { %479 = vmatpush.bf16.msra.mxu0 %v980_v25  ;;  %649 = vmatpush.bf16.msra.mxu2 %v1070_v58  ;;  %v1050_v16 = vor.u32 %v1146_v12, %v1047_v14  ;;  %v1145_v18 = vld [vmem:[#allocation8 + $0x24] sm:$0xf0]  ;;  %v1144_v19 = vld [vmem:[#allocation8 + $0x24] sm:$0xf]  ;;  %v1039_v22 = vld [vmem:[#allocation8 + $0x28] sm:$0xf0] }
  0x51   : > { %663 = vmatpush.bf16.msra.mxu3 %v1074_v60  ;;  %v1038_v21 = vor.u32 %v1145_v18, %v1037_v17  ;;  %v1042_v24 = vor.u32 %v1144_v19, %v1039_v22  ;;  %v1029_v26 = vld [vmem:[#allocation8 + $0x10] sm:$0xf]  ;;  %v1143_v27 = vld [vmem:[#allocation8 + $0x14] sm:$0xf0]  ;;  %v1142_v29 = vld [vmem:[#allocation8 + $0x14] sm:$0xf] }
  0x52   : > { %493 = vmatpush.bf16.msra.mxu1 %v984_v33  ;;  %v1030_v28 = vor.u32 %v1143_v27, %v1029_v26  ;;  %v1031_v30 = vld [vmem:[#allocation8 + $0x18] sm:$0xf0]  ;;  %v1021_v32 = vld [vmem:[#allocation8] sm:$0xf]  ;;  %v1141_v33 = vld [vmem:[#allocation8 + $0x4] sm:$0xf0] }
  0x53   : > { %v1140_v34 = vld [vmem:[#allocation8 + $0x4] sm:$0xf]  ;;  %v1022_v36 = vor.u32 %v1141_v33, %v1021_v32  ;;  %v1163_v11 = vld [vmem:[#allocation10 + $0x38] sm:$0xff]  ;;  %v1162_v12 = vld [vmem:[#allocation10 + $0x30] sm:$0xff]  ;;  %s1164_s23 = sshll.u32 %s1572_s28, 4  ;;  %s362_s15 = scalar_lea.vmem [#allocation11], %s948_s19 }
  0x54   : > { %480 = vmatpush.bf16.msra.mxu0 %v972_v31  ;;  %650 = vmatpush.bf16.msra.mxu2 %v1062_v0  ;;  %v1034_v31 = vor.u32 %v1142_v29, %v1031_v30  ;;  %v561_v14 = vld [vmem:[%s1746_s4] sm:$0x3]  ;;  %v1159_v17 = vld [vmem:[#allocation10 + $0x18] sm:$0xff]  ;;  %s817_s14 = scalar_lea.hbm %s1749_s7, %s1164_s23  ;;  %s818_s17 = sshll.u32 %s362_s15, 4  ;;  %s819_s17 = int_to_ptr.vmem [resolvable:$true] %s818_s17 }
  0x55   : > { %664 = vmatpush.bf16.msra.mxu3 %v1066_v2  ;;  %v1157_v22 = vld [vmem:[#allocation10 + $0x8] sm:$0xff]  ;;  %s820_s20 = sshll.u32 %s817_s14, 4  ;;  %s806_s1 = scalar_lea.sflag [#allocation4], %s1671_s13  ;;  %s821_s20 = int_to_ptr.hbm [resolvable:$true] %s820_s20 }
  0x56   : > { %494 = vmatpush.bf16.msra.mxu1 %v976_v39  ;;  %s1439_s10 = sshra.s32 %s821_s20, 4  ;;  %s1445_s19 = scalar_lea.hbm %s1749_s7, 32  ;;  %s1440_s10 = int_to_ptr.hbm [resolvable:$true] %s1439_s10 }
  0x57   : > { %s1441_s28 = scalar_lea.hbm %s1440_s10, 16  ;;  %p1446_p11 = scmp.lt.s32.totalorder %s1440_s10, %s1749_s7 }
  0x58   : > { %481 = vmatpush.bf16.msra.mxu0 %v964_v37  ;;  %651 = vmatpush.bf16.msra.mxu2 %v1054_v6  ;;  %v1023_v37 = vld [vmem:[#allocation8 + $0x8] sm:$0xf0]  ;;  %p1442_p1 = scmp.ne.s32.totalorder %s1440_s10, %s1441_s28  ;;  %p1447_p9 = scmp.lt.s32.totalorder %s1445_s19, %s1441_s28 }
  0x59   : > { %665 = vmatpush.bf16.msra.mxu3 %v1058_v8  ;;  %v1026_v39 = vor.u32 %v1140_v34, %v1023_v37 }
  0x5a   : > { %495 = vmatpush.bf16.msra.mxu1 %v968_v44  ;;  %p1443_p4 = pnand %p1442_p1, %p1641_p5  ;;  %p1448_p2 = por %p1447_p9, %p1446_p11 }
  0x5c   : > { %482 = vmatpush.bf16.msra.mxu0 %v956_v43  ;;  %652 = vmatpush.bf16.msra.mxu2 %v1046_v13  ;;  %v1161_v13 = vld [vmem:[#allocation10 + $0x28] sm:$0xff]  ;;  %p1444_p8 = pneg %p1443_p4 }
  0x5d   : > { %666 = vmatpush.bf16.msra.mxu3 %v1050_v16  ;;  %v564_v16 = vperm.slane %v561_v14, 0 }
  0x5e   : > { %496 = vmatpush.bf16.msra.mxu1 %v960_v48  ;;  %p1449_p10 = pnand %p1448_p2, %p1444_p8 }
  0x5f   : > { %483 = vmatmul.bf16.vlgmr.msra.gmra.mxu0 %v1123_v47 }
  0x60   : > { %653 = vmatpush.bf16.msra.mxu2 %v1038_v21  ;;  %789 = vmatpush.bf16.msrb.mxu0 %v1163_v11 }
  0x61   : > { %497 = vmatmul.bf16.vlgmr.msra.gmra.mxu1 %v1123_v47  ;;  %667 = vmatpush.bf16.msra.mxu3 %v1042_v24 }
  0x64   : > { %654 = vmatpush.bf16.msra.mxu2 %v1030_v28  ;;  %790 = vmatpush.bf16.msrb.mxu0 %v1162_v12 }
  0x65   : > { %668 = vmatpush.bf16.msra.mxu3 %v1034_v31 }
  0x68   : > { %655 = vmatpush.bf16.msra.mxu2 %v1022_v36  ;;  %791 = vmatpush.bf16.msrb.mxu0 %v1161_v13 }
  0x69   : > { %669 = vmatpush.bf16.msra.mxu3 %v1026_v39 }
  0xdc   : > { %v484_v20 = vpop.f32.mrf.mxu0 }
  0xdd   : > { %v485_v23 = vadd.f32 %v484_v20, %v385_v15  ;;  %v1158_v20 = vld [vmem:[#allocation10 + $0x10] sm:$0xff] }
  0xde   : > { %v498_v49 = vpop.f32.mrf.mxu1 }
  0xdf   : > { %v1017_v25 = vmul.f32 -1.442695, %v485_v23  ;;  %v499_v4 = vadd.f32 %v498_v49, %v386_v59 }
  0xe1   : > { %1259 = vpow2.f32 %v1017_v25  ;;  %v1156_v25 = vld [vmem:[#allocation10] sm:$0xff] }
  0xe4   : > { %v486_v35 = vpop.f32.mrf.mxu0 }
  0xe5   : > { %v487_v38 = vadd.f32 %v486_v35, %v385_v15  ;;  %v1160_v15 = vld [vmem:[#allocation10 + $0x20] sm:$0xff] }
  0xe6   : > { %v500_v1 = vpop.f32.mrf.mxu1  ;;  %792 = vmatpush.bf16.msrb.mxu0 %v1160_v15 }
  0xe7   : > { %v1260_v40 = vpop.eup %1259  ;;  %v1018_v41 = vmul.f32 -1.442695, %v487_v38  ;;  %v501_v7 = vadd.f32 %v500_v1, %v386_v59 }
  0xe8   : > { %v509_v42 = vadd.f32 1.0, %v1260_v40 }
  0xe9   : > { %1261 = vpow2.f32 %v1018_v41 }
  0xea   : > { %1263 = vrcp.f32 %v509_v42  ;;  %v522_v52 = vand.u32 2147483648, %v509_v42  ;;  %vm516_vm1 = vweird.f32 %v509_v42  ;;  %v520_v53 = vand.u32 2147483647, %v509_v42  ;;  %793 = vmatpush.bf16.msrb.mxu0 %v1159_v17 }
  0xec   : > { %v523_v57 = vor.u32 1.1754944e-38, %v522_v52  ;;  %vm521_vm3 = vcmp.eq.f32.partialorder %v520_v53, 8.507059e+37 }
  0xee   : > { %794 = vmatpush.bf16.msrb.mxu0 %v1158_v20 }
  0xef   : > { %v1262_v43 = vpop.eup %1261 }
  0xf0   : > { %v1264_v44 = vpop.eup %1263  ;;  %v510_v45 = vadd.f32 1.0, %v1262_v43 }
  0xf1   : > { %v512_v46 = vmul.f32 %v1264_v44, %v509_v42  ;;  %vm517_vm0 = vweird.f32 %v1264_v44 }
  0xf2   : > { %1265 = vrcp.f32 %v510_v45  ;;  %vm518_vm2 = vmor %vm516_vm1, %vm517_vm0  ;;  %v537_v58 = vand.u32 2147483648, %v510_v45  ;;  %v535_v61 = vand.u32 2147483647, %v510_v45  ;;  %vm531_vm5 = vweird.f32 %v510_v45  ;;  %795 = vmatpush.bf16.msrb.mxu0 %v1157_v22 }
  0xf3   : > { %v513_v47 = vsub.f32 1.0, %v512_v46  ;;  %v565_v46 = vperm.slane %v561_v14, 1 }
  0xf4   : > { %v538_v0 = vor.u32 1.1754944e-38, %v537_v58  ;;  %vm536_vm7 = vcmp.eq.f32.partialorder %v535_v61, 8.507059e+37 }
  0xf5   : > { %v514_v48 = vmul.f32 %v1264_v44, %v513_v47 }
  0xf6   : > { %796 = vmatpush.bf16.msrb.mxu0 %v1156_v25 }
  0xf7   : > { %v515_v50 = vadd.f32 %v1264_v44, %v514_v48 }
  0xf8   : > { %v1266_v51 = vpop.eup %1265 }
  0xf9   : > { %v527_v54 = vmul.f32 %v1266_v51, %v510_v45  ;;  %v519_v55 = vsel %vm518_vm2, %v1264_v44, %v515_v50  ;;  %vm532_vm4 = vweird.f32 %v1266_v51 }
  0xfa   : > { %v524_v62 = vsel %vm521_vm3, %v523_v57, %v519_v55  ;;  %vm533_vm6 = vmor %vm531_vm5, %vm532_vm4 }
  0xfb   : > { %v528_v56 = vsub.f32 1.0, %v527_v54  ;;  %v541_v2 = vmul.f32 %v524_v62, %v485_v23 }
  0xfd   : > { %v529_v60 = vmul.f32 %v1266_v51, %v528_v56  ;;  %v1694_v8 = vmul.f32 %v541_v2, %v499_v4 }
  0xff   : > { %v530_v63 = vadd.f32 %v1266_v51, %v529_v60 }
 0x101   : > { %v534_v3 = vsel %vm533_vm6, %v1266_v51, %v530_v63  ;;  %v1258_v63 = vld [vmem:[%s1748_s6] ss:$0 sm:$0xff] }
 0x102   : > { %v539_v5 = vsel %vm536_vm7, %v538_v0, %v534_v3 }
 0x103   : > { %v542_v6 = vmul.f32 %v539_v5, %v487_v38 }
 0x105   : > { %v1696_v9 = vmul.f32 %v542_v6, %v501_v7 }
 0x107   : > { %v562_v10 = vpack.c.bf16 %v1696_v9, %v1694_v8 }
 0x109   : > { %656 = vmatmul.bf16.vlgmr.msra.gmra.mxu2 %v562_v10  ;;  %670 = vmatmul.bf16.vlgmr.msra.gmra.mxu3 %v562_v10 }
 0x18c   : > { %v657_v18 = vpop.f32.mrf.mxu2  ;;  %v671_v36 = vpop.f32.mrf.mxu3 }
 0x18d   : > { %v658_v19 = vadd.f32 %v657_v18, %v564_v16  ;;  %v672_v53 = vadd.f32 %v671_v36, %v565_v46 }
 0x18f   : > { %v1083_v21 = vmul.f32 -1.442695, %v658_v19 }
 0x191   : > { %1267 = vpow2.f32 %v1083_v21 }
 0x194   : > { %v659_v23 = vpop.f32.mrf.mxu2  ;;  %v673_v52 = vpop.f32.mrf.mxu3 }
 0x195   : > { %v660_v24 = vadd.f32 %v659_v23, %v564_v16  ;;  %v674_v58 = vadd.f32 %v673_v52, %v565_v46 }
 0x197   : > { %v1268_v26 = vpop.eup %1267  ;;  %v1084_v27 = vmul.f32 -1.442695, %v660_v24 }
 0x198   : > { %v682_v28 = vadd.f32 1.0, %v1268_v26 }
 0x199   : > { %1269 = vpow2.f32 %v1084_v27 }
 0x19a   : > { %1271 = vrcp.f32 %v682_v28  ;;  %v695_v35 = vand.u32 2147483648, %v682_v28  ;;  %vm689_vm9 = vweird.f32 %v682_v28  ;;  %v693_v38 = vand.u32 2147483647, %v682_v28 }
 0x19c   : > { %v696_v42 = vor.u32 1.1754944e-38, %v695_v35  ;;  %vm694_vm11 = vcmp.eq.f32.partialorder %v693_v38, 8.507059e+37 }
 0x19f   : > { %v1270_v29 = vpop.eup %1269 }
 0x1a0   : > { %v1272_v30 = vpop.eup %1271  ;;  %v683_v31 = vadd.f32 1.0, %v1270_v29 }
 0x1a1   : > { %v685_v32 = vmul.f32 %v1272_v30, %v682_v28  ;;  %vm690_vm8 = vweird.f32 %v1272_v30 }
 0x1a2   : > { %1273 = vrcp.f32 %v683_v31  ;;  %vm691_vm10 = vmor %vm689_vm9, %vm690_vm8  ;;  %v710_v45 = vand.u32 2147483648, %v683_v31  ;;  %v708_v48 = vand.u32 2147483647, %v683_v31  ;;  %vm704_vm13 = vweird.f32 %v683_v31 }
 0x1a3   : > { %v686_v33 = vsub.f32 1.0, %v685_v32 }
 0x1a4   : > { %v711_v51 = vor.u32 1.1754944e-38, %v710_v45  ;;  %vm709_vm15 = vcmp.eq.f32.partialorder %v708_v48, 8.507059e+37 }
 0x1a5   : > { %v687_v34 = vmul.f32 %v1272_v30, %v686_v33 }
 0x1a7   : > { %v688_v37 = vadd.f32 %v1272_v30, %v687_v34 }
 0x1a8   : > { %v1274_v39 = vpop.eup %1273 }
 0x1a9   : > { %v692_v40 = vsel %vm691_vm10, %v1272_v30, %v688_v37  ;;  %v700_v41 = vmul.f32 %v1274_v39, %v683_v31  ;;  %vm705_vm12 = vweird.f32 %v1274_v39 }
 0x1aa   : > { %v697_v44 = vsel %vm694_vm11, %v696_v42, %v692_v40  ;;  %vm706_vm14 = vmor %vm704_vm13, %vm705_vm12 }
 0x1ab   : > { %v701_v43 = vsub.f32 1.0, %v700_v41  ;;  %v714_v49 = vmul.f32 %v697_v44, %v658_v19 }
 0x1ad   : > { %v702_v47 = vmul.f32 %v1274_v39, %v701_v43  ;;  %v716_v56 = vmul.f32 %v714_v49, %v672_v53 }
 0x1af   : > { %v703_v50 = vadd.f32 %v1274_v39, %v702_v47  ;;  %v718_v60 = vadd.f32 %v716_v56, %v1694_v8 }
 0x1b1   : > { %v707_v54 = vsel %vm706_vm14, %v1274_v39, %v703_v50 }
 0x1b2   : > { %v712_v55 = vsel %vm709_vm15, %v711_v51, %v707_v54 }
 0x1b3   : > { %v715_v57 = vmul.f32 %v712_v55, %v660_v24 }
 0x1b5   : > { %v717_v59 = vmul.f32 %v715_v57, %v674_v58 }
 0x1b7   : > { %v719_v61 = vadd.f32 %v717_v59, %v1696_v9 }
 0x1b9   : > { %v737_v62 = vpack.c.bf16 %v719_v61, %v718_v60 }
 0x1bb   : > { %797 = vmatmul.bf16.vlgmr.msrb.gmra.mxu0 %v737_v62 }
 0x238   : > { %v798_v0 = vpop.f32.mrf.mxu0 }
 0x239   : > { %v799_v1 = vadd.f32 %v1258_v63, %v798_v0 }
 0x23b   : > { %803 = vst [vmem:[%s362_s15] sm:$0xff] %v799_v1 }
 0x240   : > { %v800_v2 = vpop.f32.mrf.mxu0 }
 0x241   : > { %v801_v3 = vadd.f32 %v1258_v63, %v800_v2 }
 0x243   : > { %804 = vst [vmem:[%s362_s15 + $0x8] sm:$0xff] %v801_v3 }
 0x244   : > { %1452 = shalt.err (!%p1449_p10)
}
 0x245   : > { %s1509_s13 = smov 128   ;;  %s1510_s23 = smov 8  }
 0x246   : > { %1183 = dma.vmem_to_hbm [thread:$0]  (%p1641_p5), %s819_s17, 256, %s821_s20, %s806_s1, %s1509_s13, %s1509_s13, %s1510_s23  }
 0x247 PF: > { %s835_s16 = sand.u32 1, %s1487_s24   ;;  %p1762_p12 = scmp.ge.s32.totalorder %s1499_s27, 2 }
 0x248   : > { %s836_s11 = scalar_lea.sflag [#allocation4], %s835_s16 }
 0x249   : > { %p1203_p13 = pnand %p1762_p12, %p1586_p6 }
 0x24b   : > { %p1204_p0 = pneg %p1203_p13 }
 0x24d   : > { %1482 = dma.done.wait (%p1204_p0), %s836_s11, 256  }
 0x24e   : > { %1484 = vsyncadd (%p1204_p0), %s836_s11, 4294967040  ;;  %p22_p3 = scmp.ge.s32.totalorder %s1628_s21, 4   ;;  %s1763_s24 = smov %s1491_s25 }
 0x24f   : > { %s1764_s25 = smov %s1495_s26  ;;  %s1765_s26 = smov %s1637_s29 }
 0x250   : > { %s1766_s27 = smov %s1628_s21  ;;  %24 = sbr.rel (!%p22_p3) target bundleno = 9 (0x9), region = 109 }
 0x255   :  { %842 = vsyncpa [#allocation3], 1 }
 0x256   :  { %844 = vsyncpa [#allocation3 + $0x1], 1 }
 0x257   :  { %845 = vsyncpa [#allocation6], 1 }
 0x258   :  { %846 = vsyncpa [#allocation9], 1 }
 0x259   :  { %847 = vsyncpa [#allocation4], 1 }
 0x25a   :  { %849 = vsyncpa [#allocation4 + $0x1], 1 }

</bundles_post_ra>
